<compile_context>
chip_gen: v6e
topology: v6e:2x2x1
jax: 0.10.0
libtpu: 0.0.40
codegen_flags: <defaults>
</compile_context>

<pallas_src>
import jax
import jax.numpy as jnp
from jax import lax
from jax.experimental import pallas as pl
from jax.experimental.pallas import tpu as pltpu


def _round_up(x, m):
    return (x + m - 1) // m * m


def gru_encoder_kernel(len_ref, h0_ref, x_ref, wi_ref, wh_ref, bi_ref, bhn_ref,
                       wfc_ref, bfc_ref, out_ref, h_ref, xp_ref):
    """One (batch_block, time_chunk) grid step of the GRU recurrence + FC.

    len_ref : (Bb, 1)       int32 sequence lengths (batch block)
    h0_ref  : (Bb, Hp)      f32 initial hidden state (batch block)
    x_ref   : (Tc, Bb, Ep)  embedded tokens for this time chunk (compute dtype)
    wi_ref  : (Ep, 3Hp)     fused input weights  [W_ir | W_iz | W_in]
    wh_ref  : (Hp, 3Hp)     fused hidden weights [W_hr | W_hz | W_hn]
    bi_ref  : (1, 3Hp)      fused biases         [b_ir+b_hr | b_iz+b_hz | b_in]
    bhn_ref : (1, Hp)       b_hn (must stay inside r * (.))
    wfc_ref : (Hp, Op), bfc_ref : (1, Op)   output_fc
    out_ref : (Bb, Op)      f32 output (written at the last time chunk)
    h_ref   : (Bb, Hp)      f32 VMEM scratch, hidden-state carry across chunks
    xp_ref  : (Tc*Bb, 3Hp)  VMEM scratch, chunk-batched input projections
    """
    Tc, Bb, Ep = x_ref.shape
    Hp = h_ref.shape[1]
    t_chunk = pl.program_id(1)
    n_chunks = pl.num_programs(1)

    # Initialize the carried hidden state at the first chunk of each batch block.
    @pl.when(t_chunk == 0)
    def _():
        h_ref[...] = h0_ref[...]

    # 1) Input projections for ALL timesteps of the chunk in one MXU matmul,
    #    r/z biases pre-folded.  Bb % 8 == 0 -> collapsing the leading dims is
    #    tile-aligned (layout-preserving).  Stored in compute dtype (bf16
    #    halves the largest VMEM buffer on the bf16 path).
    x2 = x_ref[...].reshape(Tc * Bb, Ep)
    xp_ref[...] = (jnp.dot(x2, wi_ref[...], preferred_element_type=jnp.float32)
                   + bi_ref[...]).astype(xp_ref.dtype)

    # Hoist loop-invariant loads / broadcasts (JAX does not CSE broadcasts).
    bhn = jnp.broadcast_to(bhn_ref[...], (Bb, Hp))
    lens = jnp.broadcast_to(len_ref[...], (Bb, Hp))
    t_base = t_chunk * Tc

    # Hoist wh only while small; for large Hp let Mosaic stream it from the
    # ref inside the loop (avoids vreg/spill pressure under the unrolled loop).
    # TODO(synk): hold wh in MXU staging registers across steps via
    # pltpu.matmul_push_rhs / matmul_acc_lhs / matmul_pop for the
    # latency-bound small-batch case.
    wh_small = (wh_ref.shape[0] * wh_ref.shape[1]
                * jnp.dtype(wh_ref.dtype).itemsize) <= (512 * 1024)
    wh_hoisted = wh_ref[...] if wh_small else None

    def step(tc, h):
        wh = wh_hoisted if wh_small else wh_ref[...]
        row = pl.multiple_of(tc * Bb, Bb)
        xp_t = xp_ref[pl.ds(row, Bb), :].astype(jnp.float32)     # (Bb, 3Hp)
        # 2) One fused h-matmul per step instead of three.
        gh = jnp.dot(h.astype(wh.dtype), wh,
                     preferred_element_type=jnp.float32)         # (Bb, 3Hp)
        r = jax.nn.sigmoid(xp_t[:, 0:Hp] + gh[:, 0:Hp])
        z = jax.nn.sigmoid(xp_t[:, Hp:2 * Hp] + gh[:, Hp:2 * Hp])
        n = jnp.tanh(xp_t[:, 2 * Hp:3 * Hp] + r * (gh[:, 2 * Hp:3 * Hp] + bhn))
        h_new = (1.0 - z) * n + z * h
        # pack_padded_sequence semantics: freeze once GLOBAL t >= length[b].
        return jnp.where(t_base + tc < lens, h_new, h)

    # 3) Full unroll for short chunks (LLO visibility); partial unroll for
    #    long chunks to bound instruction-stream / vreg pressure.
    unroll = Tc if Tc <= 16 else 8
    h_ref[...] = lax.fori_loop(0, Tc, step, h_ref[...], unroll=unroll)

    # output_fc at the last chunk (lane-dense (Bb, Op) store).
    @pl.when(t_chunk == n_chunks - 1)
    def _():
        out_ref[...] = (jnp.dot(h_ref[...].astype(wfc_ref.dtype), wfc_ref[...],
                                preferred_element_type=jnp.float32)
                        + bfc_ref[...])


def program_encoder_forward(tokens, seq_lengths, params, *,
                            compute_dtype=jnp.float32,
                            time_chunk=None, batch_block=None):
    """tokens: (B, T) int32, seq_lengths: (B,) int32 -> (B, O) float32."""
    B, T = tokens.shape
    E = params["embedding"].shape[1]
    H = params["w_hr"].shape[0]
    O = params["w_fc"].shape[1]

    cdt = jnp.dtype(compute_dtype)
    cs = cdt.itemsize
    # bf16 packs 16 sublanes per vreg -> round batch to 16 so the per-step h
    # tile / MXU feed is fully packed; f32 needs 8.
    sub = 16 if cdt == jnp.dtype(jnp.bfloat16) else 8
    Bp = _round_up(B, sub)
    Ep = _round_up(E, 128)
    # NOTE: per-gate padding to Hp means the matmul N dim is 3*Hp even when
    # the real H << 128 (lanes spent on zeros); kept for lane-aligned r/z/n
    # slices — zero cost when production H is already a multiple of 128.
    Hp = _round_up(H, 128)
    Op = _round_up(O, 128)

    # Batch blocking: 2 blocks feed v7x's 2 TensorCores via the "parallel"
    # axis when the split keeps full sublane packing; harmless on v5e/v6e.
    if batch_block is None:
        half = Bp // 2
        batch_block = half if (half >= sub and half % sub == 0) else Bp
    Bb = int(batch_block)
    assert Bp % Bb == 0 and Bb % sub == 0
    nB = Bp // Bb

    # Time chunking: budget 2x double-buffered x chunk + xp scratch <= ~12 MiB
    # so the kernel fits v7x's 64 MiB physical (32 MiB scoped default) and
    # v5e's 16 MiB scoped default with the explicit vmem limit below.
    if time_chunk is None:
        budget = 12 * 1024 * 1024
        per_t = Bb * (2 * Ep + 3 * Hp) * cs
        time_chunk = max(1, min(T, budget // per_t))
    Tc = int(time_chunk)
    nT = pl.cdiv(T, Tc)
    Tp = nT * Tc

    def pad2(a, r, c):
        return jnp.pad(a, ((0, r - a.shape[0]), (0, c - a.shape[1])))

    # --- fused / zero-padded parameters (tiny one-time wrapper glue) ---
    wi = jnp.concatenate([pad2(params["w_ir"], Ep, Hp),
                          pad2(params["w_iz"], Ep, Hp),
                          pad2(params["w_in"], Ep, Hp)], axis=1)        # (Ep,3Hp)
    wh = jnp.concatenate([pad2(params["w_hr"], Hp, Hp),
                          pad2(params["w_hz"], Hp, Hp),
                          pad2(params["w_hn"], Hp, Hp)], axis=1)        # (Hp,3Hp)
    bi = jnp.concatenate([pad2(params["b_ir"] + params["b_hr"], 1, Hp),
                          pad2(params["b_iz"] + params["b_hz"], 1, Hp),
                          pad2(params["b_in"], 1, Hp)], axis=1)         # (1,3Hp)
    bhn = pad2(params["b_hn"], 1, Hp)                                   # (1, Hp)
    wfc = pad2(params["w_fc"], Hp, Op)                                  # (Hp, Op)
    bfc = pad2(params["b_fc"], 1, Op)                                   # (1, Op)
    h0 = pad2(params["h0"], Bp, Hp)                                     # (Bp, Hp)

    # --- embedding lookup, directly in time-major order (the transpose is on
    #     the tiny int32 token matrix, so x is written to HBM exactly once) ---
    tok = jnp.pad(tokens.astype(jnp.int32), ((0, Bp - B), (0, 0)))      # (Bp, T)
    tok_tm = jnp.transpose(tok, (1, 0)).reshape(T * Bp)                 # time-major
    x = jnp.take(params["embedding"], tok_tm, axis=0)                   # (T*Bp, E)
    x = jnp.pad(x, ((0, (Tp - T) * Bp), (0, Ep - E))).astype(compute_dtype)
    x = x.reshape(Tp, Bp, Ep)                                           # free view
    # (Padded batch rows gather embedding row 0 — inert because their length
    #  is 0, so their hidden state stays frozen at the zero-padded h0.)
    # TODO(synk): fuse the embedding gather into the kernel (scalar-prefetched
    # tokens + in-kernel DMA gather of embedding rows) to drop this HBM pass.

    lens = jnp.pad(seq_lengths.astype(jnp.int32), (0, Bp - B)).reshape(Bp, 1)

    # MXU operands may be bf16 (fine on v5e/v6e/v7x: only the MXU touches
    # bf16; accumulation and gate math stay f32).
    wi = wi.astype(compute_dtype)
    wh = wh.astype(compute_dtype)
    wfc = wfc.astype(compute_dtype)

    in_specs = [
        pl.BlockSpec((Bb, 1), lambda b, t: (b, 0)),            # lens
        pl.BlockSpec((Bb, Hp), lambda b, t: (b, 0)),           # h0
        pl.BlockSpec((Tc, Bb, Ep), lambda b, t: (t, b, 0)),    # x chunk (dbl-buf)
        pl.BlockSpec((Ep, 3 * Hp), lambda b, t: (0, 0)),       # wi
        pl.BlockSpec((Hp, 3 * Hp), lambda b, t: (0, 0)),       # wh
        pl.BlockSpec((1, 3 * Hp), lambda b, t: (0, 0)),        # bi
        pl.BlockSpec((1, Hp), lambda b, t: (0, 0)),            # bhn
        pl.BlockSpec((Hp, Op), lambda b, t: (0, 0)),           # wfc
        pl.BlockSpec((1, Op), lambda b, t: (0, 0)),            # bfc
    ]
    out_spec = pl.BlockSpec((Bb, Op), lambda b, t: (b, 0))

    # Explicit scoped-VMEM limit sized to the actual buffers (defaults are
    # 16 MiB on v5e / 32 MiB on v6e/v7x); capped at v7x's 64 MiB physical.
    est = (2 * Tc * Bb * Ep * cs                     # x, double-buffered
           + Tc * Bb * 3 * Hp * cs                   # xp scratch
           + 2 * (Ep * 3 * Hp + Hp * 3 * Hp + Hp * Op) * cs   # weights
           + 2 * (4 * Hp + Op) * 4                   # biases
           + Bb * Hp * 4                             # h scratch
           + 2 * Bb * (Op + Hp + 1) * 4)             # out / h0 / lens blocks
    vmem_limit = int(min(max(32 * 1024 * 1024, (3 * est) // 2),
                         64 * 1024 * 1024))

    cost = pl.CostEstimate(
        flops=int(2 * Tp * Bp * 3 * Hp * (Ep + Hp) + 2 * Bp * Hp * Op),
        transcendentals=int(3 * Tp * Bp * Hp),
        bytes_accessed=int(Tp * Bp * Ep * cs
                           + (Ep + Hp) * 3 * Hp * cs + Hp * Op * cs
                           + Bp * (Hp + Op + 1) * 4 + (4 * Hp + Op) * 4),
    )

    out = pl.pallas_call(
        gru_encoder_kernel,
        out_shape=jax.ShapeDtypeStruct((Bp, Op), jnp.float32),
        grid=(nB, nT),
        in_specs=in_specs,
        out_specs=out_spec,
        scratch_shapes=[pltpu.VMEM((Bb, Hp), jnp.float32),          # h carry
                        pltpu.VMEM((Tc * Bb, 3 * Hp), compute_dtype)],  # xp
        compiler_params=pltpu.CompilerParams(
            dimension_semantics=("parallel", "arbitrary"),
            vmem_limit_bytes=vmem_limit),
        cost_estimate=cost,
    )(lens, h0, x, wi, wh, bi, bhn, wfc, bfc)

    return out[:B, :O]


def make_params(key, vocab_size, E, H, O, B):
    ks = jax.random.split(key, 17)
    s = 0.1
    p = {
        "embedding": jax.random.normal(ks[0], (vocab_size, E), jnp.float32) * s,
        # GRU weights stored transposed: x @ W_i*  (E, H),  h @ W_h*  (H, H)
        "w_ir": jax.random.normal(ks[1], (E, H), jnp.float32) * s,
        "w_iz": jax.random.normal(ks[2], (E, H), jnp.float32) * s,
        "w_in": jax.random.normal(ks[3], (E, H), jnp.float32) * s,
        "w_hr": jax.random.normal(ks[4], (H, H), jnp.float32) * s,
        "w_hz": jax.random.normal(ks[5], (H, H), jnp.float32) * s,
        "w_hn": jax.random.normal(ks[6], (H, H), jnp.float32) * s,
        "b_ir": jax.random.normal(ks[7], (1, H), jnp.float32) * s,
        "b_iz": jax.random.normal(ks[8], (1, H), jnp.float32) * s,
        "b_in": jax.random.normal(ks[9], (1, H), jnp.float32) * s,
        "b_hr": jax.random.normal(ks[10], (1, H), jnp.float32) * s,
        "b_hz": jax.random.normal(ks[11], (1, H), jnp.float32) * s,
        "b_hn": jax.random.normal(ks[12], (1, H), jnp.float32) * s,
        # output_fc: Linear(H, O), stored transposed (H, O)
        "w_fc": jax.random.normal(ks[13], (H, O), jnp.float32) * s,
        "b_fc": jax.random.normal(ks[14], (1, O), jnp.float32) * s,
        # init_hidden: deterministic stand-in for xavier_normal_ h0 (1 layer -> (B, H))
        "h0": jax.random.normal(ks[15], (B, H), jnp.float32) * s,
    }
    return p


def reference_forward(tokens, seq_lengths, params):
    """Pure-JAX f32 reference of the same math for a correctness check."""
    x = jnp.take(params["embedding"], tokens, axis=0)  # (B, T, E)
    B, T, _ = x.shape
    h = params["h0"]
    for t in range(T):
        xt = x[:, t, :]
        r = jax.nn.sigmoid(xt @ params["w_ir"] + params["b_ir"]
                           + h @ params["w_hr"] + params["b_hr"])
        z = jax.nn.sigmoid(xt @ params["w_iz"] + params["b_iz"]
                           + h @ params["w_hz"] + params["b_hz"])
        n = jnp.tanh(xt @ params["w_in"] + params["b_in"]
                     + r * (h @ params["w_hn"] + params["b_hn"]))
        h_new = (1.0 - z) * n + z * h
        mask = (t < seq_lengths).reshape(B, 1)
        h = jnp.where(mask, h_new, h)
    return h @ params["w_fc"] + params["b_fc"]


if __name__ == "__main__":
    key = jax.random.PRNGKey(0)
    vocab_size, E, H, O = 50, 32, 32, 16

    # --- case 1: tiny batch, single chunk -------------------------------
    B, T = 2, 8
    k_tok, k_par, k2 = jax.random.split(key, 3)
    tokens = jax.random.randint(k_tok, (B, T), 0, vocab_size, dtype=jnp.int32)
    seq_lengths = jnp.array([8, 5], dtype=jnp.int32)
    params = make_params(k_par, vocab_size, E, H, O, B)
    ref = reference_forward(tokens, seq_lengths, params)

    out = jax.block_until_ready(program_encoder_forward(tokens, seq_lengths, params))
    assert out.shape == (B, O)
    assert jnp.allclose(out, ref, atol=1e-4, rtol=1e-4), "f32 mismatch vs reference"

    # same inputs, forced multi-chunk grid (exercises the h carry + global-t freeze)
    out_c = jax.block_until_ready(
        program_encoder_forward(tokens, seq_lengths, params, time_chunk=4))
    assert jnp.allclose(out_c, ref, atol=1e-4, rtol=1e-4), "chunked f32 mismatch"

    # bf16 MXU-operand path (bf16 xp scratch), f32 accumulation/gate math
    out_bf16 = jax.block_until_ready(
        program_encoder_forward(tokens, seq_lengths, params,
                                compute_dtype=jnp.bfloat16))
    assert jnp.allclose(out_bf16, ref, atol=5e-2, rtol=5e-2), "bf16 mismatch vs reference"

    # --- case 2: larger batch -> 2 batch blocks ("parallel" axis) + 3 T-chunks
    B2, T2 = 10, 12
    k_tok2, k_par2, k_len2 = jax.random.split(k2, 3)
    tokens2 = jax.random.randint(k_tok2, (B2, T2), 0, vocab_size, dtype=jnp.int32)
    seq_lengths2 = jax.random.randint(k_len2, (B2,), 1, T2 + 1, dtype=jnp.int32)
    params2 = make_params(k_par2, vocab_size, E, H, O, B2)
    ref2 = reference_forward(tokens2, seq_lengths2, params2)

    out2 = jax.block_until_ready(
        program_encoder_forward(tokens2, seq_lengths2, params2, time_chunk=4))
    assert out2.shape == (B2, O)
    assert jnp.allclose(out2, ref2, atol=1e-4, rtol=1e-4), "gridded f32 mismatch"

    print("KERNEL_OK")
</pallas_src>

<mosaic_0001>
module attributes {stable_mosaic.version = 11 : i64} {
  func.func @gru_encoder_kernel(%arg0: i32, %arg1: i32, %arg2: memref<8x1xi32, #tpu.memory_space<vmem>>, %arg3: memref<8x128xf32, #tpu.memory_space<vmem>>, %arg4: memref<8x8x128xf32, #tpu.memory_space<vmem>>, %arg5: memref<128x384xf32, #tpu.memory_space<vmem>>, %arg6: memref<128x384xf32, #tpu.memory_space<vmem>>, %arg7: memref<1x384xf32, #tpu.memory_space<vmem>>, %arg8: memref<1x128xf32, #tpu.memory_space<vmem>>, %arg9: memref<128x128xf32, #tpu.memory_space<vmem>>, %arg10: memref<1x128xf32, #tpu.memory_space<vmem>>, %arg11: memref<8x128xf32, #tpu.memory_space<vmem>>, %arg12: memref<8x128xf32, #tpu.memory_space<vmem>>, %arg13: memref<64x384xf32, #tpu.memory_space<vmem>>) attributes {dimension_semantics = [#tpu.dimension_semantics<parallel>, #tpu.dimension_semantics<arbitrary>], iteration_bounds = array<i64: 1, 1>, scalar_prefetch = 0 : i64, scratch_operands = 2 : i64, tpu.core_type = #tpu.core_type<tc>, window_params = [{transform_indices = @transform_0, window_bounds = array<i64: 8, 1>}, {transform_indices = @transform_1, window_bounds = array<i64: 8, 128>}, {transform_indices = @transform_2, window_bounds = array<i64: 8, 8, 128>}, {pipeline_mode = #tpu.pipeline_mode<synchronous>, transform_indices = @transform_3, window_bounds = array<i64: 128, 384>}, {pipeline_mode = #tpu.pipeline_mode<synchronous>, transform_indices = @transform_4, window_bounds = array<i64: 128, 384>}, {pipeline_mode = #tpu.pipeline_mode<synchronous>, transform_indices = @transform_5, window_bounds = array<i64: 1, 384>}, {pipeline_mode = #tpu.pipeline_mode<synchronous>, transform_indices = @transform_6, window_bounds = array<i64: 1, 128>}, {pipeline_mode = #tpu.pipeline_mode<synchronous>, transform_indices = @transform_7, window_bounds = array<i64: 128, 128>}, {pipeline_mode = #tpu.pipeline_mode<synchronous>, transform_indices = @transform_8, window_bounds = array<i64: 1, 128>}, {transform_indices = @transform_9, window_bounds = array<i64: 8, 128>}]} {
    %c0_i32 = arith.constant 0 : i32
    %0 = arith.cmpi eq, %arg1, %c0_i32 : i32
    %1 = arith.extui %0 : i1 to i32
    %c0_i32_0 = arith.constant 0 : i32
    %2 = arith.cmpi ne, %1, %c0_i32_0 : i32
    scf.if %2 {
      %c0_71 = arith.constant 0 : index
      %c0_72 = arith.constant 0 : index
      %312 = vector.load %arg3[%c0_71, %c0_72] : memref<8x128xf32, #tpu.memory_space<vmem>>, vector<8x128xf32>
      %c0_73 = arith.constant 0 : index
      %c0_74 = arith.constant 0 : index
      %313 = vector.load %arg12[%c0_73, %c0_74] : memref<8x128xf32, #tpu.memory_space<vmem>>, vector<8x128xf32>
      tpu.vector_store %arg12[%c0_73, %c0_74], %312 {strides = array<i32>} : memref<8x128xf32, #tpu.memory_space<vmem>>, vector<8x128xf32>,
    } else {
    }
    %c0 = arith.constant 0 : index
    %c0_1 = arith.constant 0 : index
    %c0_2 = arith.constant 0 : index
    %3 = vector.load %arg4[%c0, %c0_1, %c0_2] : memref<8x8x128xf32, #tpu.memory_space<vmem>>, vector<8x8x128xf32>
    %4 = vector.shape_cast %3 : vector<8x8x128xf32> to vector<64x128xf32>
    %c0_3 = arith.constant 0 : index
    %c0_4 = arith.constant 0 : index
    %5 = vector.load %arg5[%c0_3, %c0_4] : memref<128x384xf32, #tpu.memory_space<vmem>>, vector<128x384xf32>
    %cst = arith.constant dense<0.000000e+00> : vector<64x384xf32>
    %6 = tpu.matmul %4, %5, %cst {dimension_numbers = #tpu.dot_dimension_numbers<[1], [0], [0], [1], [0, 0, 1, 1], [], []>} : vector<64x128xf32>, vector<128x384xf32>, vector<64x384xf32> -> vector<64x384xf32>
    %c0_5 = arith.constant 0 : index
    %c0_6 = arith.constant 0 : index
    %7 = vector.load %arg7[%c0_5, %c0_6] : memref<1x384xf32, #tpu.memory_space<vmem>>, vector<1x384xf32>
    %8 = vector.broadcast %7 : vector<1x384xf32> to vector<64x384xf32>
    %9 = arith.addf %6, %8 : vector<64x384xf32>
    %c0_7 = arith.constant 0 : index
    %c0_8 = arith.constant 0 : index
    %10 = vector.load %arg13[%c0_7, %c0_8] : memref<64x384xf32, #tpu.memory_space<vmem>>, vector<64x384xf32>
    tpu.vector_store %arg13[%c0_7, %c0_8], %9 {strides = array<i32>} : memref<64x384xf32, #tpu.memory_space<vmem>>, vector<64x384xf32>,
    %c0_9 = arith.constant 0 : index
    %c0_10 = arith.constant 0 : index
    %11 = vector.load %arg8[%c0_9, %c0_10] : memref<1x128xf32, #tpu.memory_space<vmem>>, vector<1x128xf32>
    %12 = vector.shape_cast %11 : vector<1x128xf32> to vector<1x128xf32>
    %13 = vector.broadcast %12 : vector<1x128xf32> to vector<8x128xf32>
    %c0_11 = arith.constant 0 : index
    %c0_12 = arith.constant 0 : index
    %14 = vector.load %arg2[%c0_11, %c0_12] : memref<8x1xi32, #tpu.memory_space<vmem>>, vector<8x1xi32>
    %15 = vector.shape_cast %14 : vector<8x1xi32> to vector<8x1xi32>
    %16 = vector.broadcast %15 : vector<8x1xi32> to vector<8x128xi32>
    %c8_i32 = arith.constant 8 : i32
    %17 = arith.muli %arg1, %c8_i32 : i32
    %c0_13 = arith.constant 0 : index
    %c0_14 = arith.constant 0 : index
    %18 = vector.load %arg6[%c0_13, %c0_14] : memref<128x384xf32, #tpu.memory_space<vmem>>, vector<128x384xf32>
    %c0_15 = arith.constant 0 : index
    %c0_16 = arith.constant 0 : index
    %19 = vector.load %arg12[%c0_15, %c0_16] : memref<8x128xf32, #tpu.memory_space<vmem>>, vector<8x128xf32>
    %c0_i32_17 = arith.constant 0 : i32
    %c8_i32_18 = arith.constant 8 : i32
    %20 = arith.muli %c0_i32_17, %c8_i32_18 : i32
    %21 = tpu.assume_multiple %20, 8 : i32
    %22 = arith.index_cast %21 : i32 to index
    %c0_19 = arith.constant 0 : index
    %23 = vector.load %arg13[%22, %c0_19] : memref<64x384xf32, #tpu.memory_space<vmem>>, vector<8x384xf32>
    %cst_20 = arith.constant dense<0.000000e+00> : vector<8x384xf32>
    %24 = tpu.matmul %19, %18, %cst_20 {dimension_numbers = #tpu.dot_dimension_numbers<[1], [0], [0], [1], [0, 0, 1, 1], [], []>} : vector<8x128xf32>, vector<128x384xf32>, vector<8x384xf32> -> vector<8x384xf32>
    %25 = vector.extract_strided_slice %23 {offsets = [0, 0], sizes = [8, 128], strides = [1, 1]} : vector<8x384xf32> to vector<8x128xf32>
    %26 = vector.extract_strided_slice %24 {offsets = [0, 0], sizes = [8, 128], strides = [1, 1]} : vector<8x384xf32> to vector<8x128xf32>
    %27 = arith.addf %25, %26 : vector<8x128xf32>
    %28 = arith.negf %27 : vector<8x128xf32>
    %29 = math.exp %28 : vector<8x128xf32>
    %cst_21 = arith.constant 1.000000e+00 : f32
    %30 = vector.broadcast %cst_21 : f32 to vector<8x128xf32>
    %31 = arith.addf %30, %29 : vector<8x128xf32>
    %32 = arith.divf %30, %31 : vector<8x128xf32>
    %33 = vector.extract_strided_slice %23 {offsets = [0, 128], sizes = [8, 128], strides = [1, 1]} : vector<8x384xf32> to vector<8x128xf32>
    %34 = vector.extract_strided_slice %24 {offsets = [0, 128], sizes = [8, 128], strides = [1, 1]} : vector<8x384xf32> to vector<8x128xf32>
    %35 = arith.addf %33, %34 : vector<8x128xf32>
    %36 = arith.negf %35 : vector<8x128xf32>
    %37 = math.exp %36 : vector<8x128xf32>
    %cst_22 = arith.constant 1.000000e+00 : f32
    %38 = vector.broadcast %cst_22 : f32 to vector<8x128xf32>
    %39 = arith.addf %38, %37 : vector<8x128xf32>
    %40 = arith.divf %38, %39 : vector<8x128xf32>
    %41 = vector.extract_strided_slice %23 {offsets = [0, 256], sizes = [8, 128], strides = [1, 1]} : vector<8x384xf32> to vector<8x128xf32>
    %42 = vector.extract_strided_slice %24 {offsets = [0, 256], sizes = [8, 128], strides = [1, 1]} : vector<8x384xf32> to vector<8x128xf32>
    %43 = arith.addf %42, %13 : vector<8x128xf32>
    %44 = arith.mulf %32, %43 : vector<8x128xf32>
    %45 = arith.addf %41, %44 : vector<8x128xf32>
    %46 = math.tanh %45 : vector<8x128xf32>
    %cst_23 = arith.constant 1.000000e+00 : f32
    %47 = vector.broadcast %cst_23 : f32 to vector<8x128xf32>
    %48 = arith.subf %47, %40 : vector<8x128xf32>
    %49 = arith.mulf %48, %46 : vector<8x128xf32>
    %50 = arith.mulf %40, %19 : vector<8x128xf32>
    %51 = arith.addf %49, %50 : vector<8x128xf32>
    %52 = arith.addi %17, %c0_i32_17 : i32
    %53 = vector.broadcast %52 : i32 to vector<8x128xi32>
    %54 = arith.cmpi slt, %53, %16 : vector<8x128xi32>
    %55 = arith.select %54, %51, %19 : vector<8x128xi1>, vector<8x128xf32>
    %c1_i32 = arith.constant 1 : i32
    %c8_i32_24 = arith.constant 8 : i32
    %56 = arith.muli %c1_i32, %c8_i32_24 : i32
    %57 = tpu.assume_multiple %56, 8 : i32
    %58 = arith.index_cast %57 : i32 to index
    %c0_25 = arith.constant 0 : index
    %59 = vector.load %arg13[%58, %c0_25] : memref<64x384xf32, #tpu.memory_space<vmem>>, vector<8x384xf32>
    %cst_26 = arith.constant dense<0.000000e+00> : vector<8x384xf32>
    %60 = tpu.matmul %55, %18, %cst_26 {dimension_numbers = #tpu.dot_dimension_numbers<[1], [0], [0], [1], [0, 0, 1, 1], [], []>} : vector<8x128xf32>, vector<128x384xf32>, vector<8x384xf32> -> vector<8x384xf32>
    %61 = vector.extract_strided_slice %59 {offsets = [0, 0], sizes = [8, 128], strides = [1, 1]} : vector<8x384xf32> to vector<8x128xf32>
    %62 = vector.extract_strided_slice %60 {offsets = [0, 0], sizes = [8, 128], strides = [1, 1]} : vector<8x384xf32> to vector<8x128xf32>
    %63 = arith.addf %61, %62 : vector<8x128xf32>
    %64 = arith.negf %63 : vector<8x128xf32>
    %65 = math.exp %64 : vector<8x128xf32>
    %cst_27 = arith.constant 1.000000e+00 : f32
    %66 = vector.broadcast %cst_27 : f32 to vector<8x128xf32>
    %67 = arith.addf %66, %65 : vector<8x128xf32>
    %68 = arith.divf %66, %67 : vector<8x128xf32>
    %69 = vector.extract_strided_slice %59 {offsets = [0, 128], sizes = [8, 128], strides = [1, 1]} : vector<8x384xf32> to vector<8x128xf32>
    %70 = vector.extract_strided_slice %60 {offsets = [0, 128], sizes = [8, 128], strides = [1, 1]} : vector<8x384xf32> to vector<8x128xf32>
    %71 = arith.addf %69, %70 : vector<8x128xf32>
    %72 = arith.negf %71 : vector<8x128xf32>
    %73 = math.exp %72 : vector<8x128xf32>
    %cst_28 = arith.constant 1.000000e+00 : f32
    %74 = vector.broadcast %cst_28 : f32 to vector<8x128xf32>
    %75 = arith.addf %74, %73 : vector<8x128xf32>
    %76 = arith.divf %74, %75 : vector<8x128xf32>
    %77 = vector.extract_strided_slice %59 {offsets = [0, 256], sizes = [8, 128], strides = [1, 1]} : vector<8x384xf32> to vector<8x128xf32>
    %78 = vector.extract_strided_slice %60 {offsets = [0, 256], sizes = [8, 128], strides = [1, 1]} : vector<8x384xf32> to vector<8x128xf32>
    %79 = arith.addf %78, %13 : vector<8x128xf32>
    %80 = arith.mulf %68, %79 : vector<8x128xf32>
    %81 = arith.addf %77, %80 : vector<8x128xf32>
    %82 = math.tanh %81 : vector<8x128xf32>
    %cst_29 = arith.constant 1.000000e+00 : f32
    %83 = vector.broadcast %cst_29 : f32 to vector<8x128xf32>
    %84 = arith.subf %83, %76 : vector<8x128xf32>
    %85 = arith.mulf %84, %82 : vector<8x128xf32>
    %86 = arith.mulf %76, %55 : vector<8x128xf32>
    %87 = arith.addf %85, %86 : vector<8x128xf32>
    %88 = arith.addi %17, %c1_i32 : i32
    %89 = vector.broadcast %88 : i32 to vector<8x128xi32>
    %90 = arith.cmpi slt, %89, %16 : vector<8x128xi32>
    %91 = arith.select %90, %87, %55 : vector<8x128xi1>, vector<8x128xf32>
    %c2_i32 = arith.constant 2 : i32
    %c8_i32_30 = arith.constant 8 : i32
    %92 = arith.muli %c2_i32, %c8_i32_30 : i32
    %93 = tpu.assume_multiple %92, 8 : i32
    %94 = arith.index_cast %93 : i32 to index
    %c0_31 = arith.constant 0 : index
    %95 = vector.load %arg13[%94, %c0_31] : memref<64x384xf32, #tpu.memory_space<vmem>>, vector<8x384xf32>
    %cst_32 = arith.constant dense<0.000000e+00> : vector<8x384xf32>
    %96 = tpu.matmul %91, %18, %cst_32 {dimension_numbers = #tpu.dot_dimension_numbers<[1], [0], [0], [1], [0, 0, 1, 1], [], []>} : vector<8x128xf32>, vector<128x384xf32>, vector<8x384xf32> -> vector<8x384xf32>
    %97 = vector.extract_strided_slice %95 {offsets = [0, 0], sizes = [8, 128], strides = [1, 1]} : vector<8x384xf32> to vector<8x128xf32>
    %98 = vector.extract_strided_slice %96 {offsets = [0, 0], sizes = [8, 128], strides = [1, 1]} : vector<8x384xf32> to vector<8x128xf32>
    %99 = arith.addf %97, %98 : vector<8x128xf32>
    %100 = arith.negf %99 : vector<8x128xf32>
    %101 = math.exp %100 : vector<8x128xf32>
    %cst_33 = arith.constant 1.000000e+00 : f32
    %102 = vector.broadcast %cst_33 : f32 to vector<8x128xf32>
    %103 = arith.addf %102, %101 : vector<8x128xf32>
    %104 = arith.divf %102, %103 : vector<8x128xf32>
    %105 = vector.extract_strided_slice %95 {offsets = [0, 128], sizes = [8, 128], strides = [1, 1]} : vector<8x384xf32> to vector<8x128xf32>
    %106 = vector.extract_strided_slice %96 {offsets = [0, 128], sizes = [8, 128], strides = [1, 1]} : vector<8x384xf32> to vector<8x128xf32>
    %107 = arith.addf %105, %106 : vector<8x128xf32>
    %108 = arith.negf %107 : vector<8x128xf32>
    %109 = math.exp %108 : vector<8x128xf32>
    %cst_34 = arith.constant 1.000000e+00 : f32
    %110 = vector.broadcast %cst_34 : f32 to vector<8x128xf32>
    %111 = arith.addf %110, %109 : vector<8x128xf32>
    %112 = arith.divf %110, %111 : vector<8x128xf32>
    %113 = vector.extract_strided_slice %95 {offsets = [0, 256], sizes = [8, 128], strides = [1, 1]} : vector<8x384xf32> to vector<8x128xf32>
    %114 = vector.extract_strided_slice %96 {offsets = [0, 256], sizes = [8, 128], strides = [1, 1]} : vector<8x384xf32> to vector<8x128xf32>
    %115 = arith.addf %114, %13 : vector<8x128xf32>
    %116 = arith.mulf %104, %115 : vector<8x128xf32>
    %117 = arith.addf %113, %116 : vector<8x128xf32>
    %118 = math.tanh %117 : vector<8x128xf32>
    %cst_35 = arith.constant 1.000000e+00 : f32
    %119 = vector.broadcast %cst_35 : f32 to vector<8x128xf32>
    %120 = arith.subf %119, %112 : vector<8x128xf32>
    %121 = arith.mulf %120, %118 : vector<8x128xf32>
    %122 = arith.mulf %112, %91 : vector<8x128xf32>
    %123 = arith.addf %121, %122 : vector<8x128xf32>
    %124 = arith.addi %17, %c2_i32 : i32
    %125 = vector.broadcast %124 : i32 to vector<8x128xi32>
    %126 = arith.cmpi slt, %125, %16 : vector<8x128xi32>
    %127 = arith.select %126, %123, %91 : vector<8x128xi1>, vector<8x128xf32>
    %c3_i32 = arith.constant 3 : i32
    %c8_i32_36 = arith.constant 8 : i32
    %128 = arith.muli %c3_i32, %c8_i32_36 : i32
    %129 = tpu.assume_multiple %128, 8 : i32
    %130 = arith.index_cast %129 : i32 to index
    %c0_37 = arith.constant 0 : index
    %131 = vector.load %arg13[%130, %c0_37] : memref<64x384xf32, #tpu.memory_space<vmem>>, vector<8x384xf32>
    %cst_38 = arith.constant dense<0.000000e+00> : vector<8x384xf32>
    %132 = tpu.matmul %127, %18, %cst_38 {dimension_numbers = #tpu.dot_dimension_numbers<[1], [0], [0], [1], [0, 0, 1, 1], [], []>} : vector<8x128xf32>, vector<128x384xf32>, vector<8x384xf32> -> vector<8x384xf32>
    %133 = vector.extract_strided_slice %131 {offsets = [0, 0], sizes = [8, 128], strides = [1, 1]} : vector<8x384xf32> to vector<8x128xf32>
    %134 = vector.extract_strided_slice %132 {offsets = [0, 0], sizes = [8, 128], strides = [1, 1]} : vector<8x384xf32> to vector<8x128xf32>
    %135 = arith.addf %133, %134 : vector<8x128xf32>
    %136 = arith.negf %135 : vector<8x128xf32>
    %137 = math.exp %136 : vector<8x128xf32>
    %cst_39 = arith.constant 1.000000e+00 : f32
    %138 = vector.broadcast %cst_39 : f32 to vector<8x128xf32>
    %139 = arith.addf %138, %137 : vector<8x128xf32>
    %140 = arith.divf %138, %139 : vector<8x128xf32>
    %141 = vector.extract_strided_slice %131 {offsets = [0, 128], sizes = [8, 128], strides = [1, 1]} : vector<8x384xf32> to vector<8x128xf32>
    %142 = vector.extract_strided_slice %132 {offsets = [0, 128], sizes = [8, 128], strides = [1, 1]} : vector<8x384xf32> to vector<8x128xf32>
    %143 = arith.addf %141, %142 : vector<8x128xf32>
    %144 = arith.negf %143 : vector<8x128xf32>
    %145 = math.exp %144 : vector<8x128xf32>
    %cst_40 = arith.constant 1.000000e+00 : f32
    %146 = vector.broadcast %cst_40 : f32 to vector<8x128xf32>
    %147 = arith.addf %146, %145 : vector<8x128xf32>
    %148 = arith.divf %146, %147 : vector<8x128xf32>
    %149 = vector.extract_strided_slice %131 {offsets = [0, 256], sizes = [8, 128], strides = [1, 1]} : vector<8x384xf32> to vector<8x128xf32>
    %150 = vector.extract_strided_slice %132 {offsets = [0, 256], sizes = [8, 128], strides = [1, 1]} : vector<8x384xf32> to vector<8x128xf32>
    %151 = arith.addf %150, %13 : vector<8x128xf32>
    %152 = arith.mulf %140, %151 : vector<8x128xf32>
    %153 = arith.addf %149, %152 : vector<8x128xf32>
    %154 = math.tanh %153 : vector<8x128xf32>
    %cst_41 = arith.constant 1.000000e+00 : f32
    %155 = vector.broadcast %cst_41 : f32 to vector<8x128xf32>
    %156 = arith.subf %155, %148 : vector<8x128xf32>
    %157 = arith.mulf %156, %154 : vector<8x128xf32>
    %158 = arith.mulf %148, %127 : vector<8x128xf32>
    %159 = arith.addf %157, %158 : vector<8x128xf32>
    %160 = arith.addi %17, %c3_i32 : i32
    %161 = vector.broadcast %160 : i32 to vector<8x128xi32>
    %162 = arith.cmpi slt, %161, %16 : vector<8x128xi32>
    %163 = arith.select %162, %159, %127 : vector<8x128xi1>, vector<8x128xf32>
    %c4_i32 = arith.constant 4 : i32
    %c8_i32_42 = arith.constant 8 : i32
    %164 = arith.muli %c4_i32, %c8_i32_42 : i32
    %165 = tpu.assume_multiple %164, 8 : i32
    %166 = arith.index_cast %165 : i32 to index
    %c0_43 = arith.constant 0 : index
    %167 = vector.load %arg13[%166, %c0_43] : memref<64x384xf32, #tpu.memory_space<vmem>>, vector<8x384xf32>
    %cst_44 = arith.constant dense<0.000000e+00> : vector<8x384xf32>
    %168 = tpu.matmul %163, %18, %cst_44 {dimension_numbers = #tpu.dot_dimension_numbers<[1], [0], [0], [1], [0, 0, 1, 1], [], []>} : vector<8x128xf32>, vector<128x384xf32>, vector<8x384xf32> -> vector<8x384xf32>
    %169 = vector.extract_strided_slice %167 {offsets = [0, 0], sizes = [8, 128], strides = [1, 1]} : vector<8x384xf32> to vector<8x128xf32>
    %170 = vector.extract_strided_slice %168 {offsets = [0, 0], sizes = [8, 128], strides = [1, 1]} : vector<8x384xf32> to vector<8x128xf32>
    %171 = arith.addf %169, %170 : vector<8x128xf32>
    %172 = arith.negf %171 : vector<8x128xf32>
    %173 = math.exp %172 : vector<8x128xf32>
    %cst_45 = arith.constant 1.000000e+00 : f32
    %174 = vector.broadcast %cst_45 : f32 to vector<8x128xf32>
    %175 = arith.addf %174, %173 : vector<8x128xf32>
    %176 = arith.divf %174, %175 : vector<8x128xf32>
    %177 = vector.extract_strided_slice %167 {offsets = [0, 128], sizes = [8, 128], strides = [1, 1]} : vector<8x384xf32> to vector<8x128xf32>
    %178 = vector.extract_strided_slice %168 {offsets = [0, 128], sizes = [8, 128], strides = [1, 1]} : vector<8x384xf32> to vector<8x128xf32>
    %179 = arith.addf %177, %178 : vector<8x128xf32>
    %180 = arith.negf %179 : vector<8x128xf32>
    %181 = math.exp %180 : vector<8x128xf32>
    %cst_46 = arith.constant 1.000000e+00 : f32
    %182 = vector.broadcast %cst_46 : f32 to vector<8x128xf32>
    %183 = arith.addf %182, %181 : vector<8x128xf32>
    %184 = arith.divf %182, %183 : vector<8x128xf32>
    %185 = vector.extract_strided_slice %167 {offsets = [0, 256], sizes = [8, 128], strides = [1, 1]} : vector<8x384xf32> to vector<8x128xf32>
    %186 = vector.extract_strided_slice %168 {offsets = [0, 256], sizes = [8, 128], strides = [1, 1]} : vector<8x384xf32> to vector<8x128xf32>
    %187 = arith.addf %186, %13 : vector<8x128xf32>
    %188 = arith.mulf %176, %187 : vector<8x128xf32>
    %189 = arith.addf %185, %188 : vector<8x128xf32>
    %190 = math.tanh %189 : vector<8x128xf32>
    %cst_47 = arith.constant 1.000000e+00 : f32
    %191 = vector.broadcast %cst_47 : f32 to vector<8x128xf32>
    %192 = arith.subf %191, %184 : vector<8x128xf32>
    %193 = arith.mulf %192, %190 : vector<8x128xf32>
    %194 = arith.mulf %184, %163 : vector<8x128xf32>
    %195 = arith.addf %193, %194 : vector<8x128xf32>
    %196 = arith.addi %17, %c4_i32 : i32
    %197 = vector.broadcast %196 : i32 to vector<8x128xi32>
    %198 = arith.cmpi slt, %197, %16 : vector<8x128xi32>
    %199 = arith.select %198, %195, %163 : vector<8x128xi1>, vector<8x128xf32>
    %c5_i32 = arith.constant 5 : i32
    %c8_i32_48 = arith.constant 8 : i32
    %200 = arith.muli %c5_i32, %c8_i32_48 : i32
    %201 = tpu.assume_multiple %200, 8 : i32
    %202 = arith.index_cast %201 : i32 to index
    %c0_49 = arith.constant 0 : index
    %203 = vector.load %arg13[%202, %c0_49] : memref<64x384xf32, #tpu.memory_space<vmem>>, vector<8x384xf32>
    %cst_50 = arith.constant dense<0.000000e+00> : vector<8x384xf32>
    %204 = tpu.matmul %199, %18, %cst_50 {dimension_numbers = #tpu.dot_dimension_numbers<[1], [0], [0], [1], [0, 0, 1, 1], [], []>} : vector<8x128xf32>, vector<128x384xf32>, vector<8x384xf32> -> vector<8x384xf32>
    %205 = vector.extract_strided_slice %203 {offsets = [0, 0], sizes = [8, 128], strides = [1, 1]} : vector<8x384xf32> to vector<8x128xf32>
    %206 = vector.extract_strided_slice %204 {offsets = [0, 0], sizes = [8, 128], strides = [1, 1]} : vector<8x384xf32> to vector<8x128xf32>
    %207 = arith.addf %205, %206 : vector<8x128xf32>
    %208 = arith.negf %207 : vector<8x128xf32>
    %209 = math.exp %208 : vector<8x128xf32>
    %cst_51 = arith.constant 1.000000e+00 : f32
    %210 = vector.broadcast %cst_51 : f32 to vector<8x128xf32>
    %211 = arith.addf %210, %209 : vector<8x128xf32>
    %212 = arith.divf %210, %211 : vector<8x128xf32>
    %213 = vector.extract_strided_slice %203 {offsets = [0, 128], sizes = [8, 128], strides = [1, 1]} : vector<8x384xf32> to vector<8x128xf32>
    %214 = vector.extract_strided_slice %204 {offsets = [0, 128], sizes = [8, 128], strides = [1, 1]} : vector<8x384xf32> to vector<8x128xf32>
    %215 = arith.addf %213, %214 : vector<8x128xf32>
    %216 = arith.negf %215 : vector<8x128xf32>
    %217 = math.exp %216 : vector<8x128xf32>
    %cst_52 = arith.constant 1.000000e+00 : f32
    %218 = vector.broadcast %cst_52 : f32 to vector<8x128xf32>
    %219 = arith.addf %218, %217 : vector<8x128xf32>
    %220 = arith.divf %218, %219 : vector<8x128xf32>
    %221 = vector.extract_strided_slice %203 {offsets = [0, 256], sizes = [8, 128], strides = [1, 1]} : vector<8x384xf32> to vector<8x128xf32>
    %222 = vector.extract_strided_slice %204 {offsets = [0, 256], sizes = [8, 128], strides = [1, 1]} : vector<8x384xf32> to vector<8x128xf32>
    %223 = arith.addf %222, %13 : vector<8x128xf32>
    %224 = arith.mulf %212, %223 : vector<8x128xf32>
    %225 = arith.addf %221, %224 : vector<8x128xf32>
    %226 = math.tanh %225 : vector<8x128xf32>
    %cst_53 = arith.constant 1.000000e+00 : f32
    %227 = vector.broadcast %cst_53 : f32 to vector<8x128xf32>
    %228 = arith.subf %227, %220 : vector<8x128xf32>
    %229 = arith.mulf %228, %226 : vector<8x128xf32>
    %230 = arith.mulf %220, %199 : vector<8x128xf32>
    %231 = arith.addf %229, %230 : vector<8x128xf32>
    %232 = arith.addi %17, %c5_i32 : i32
    %233 = vector.broadcast %232 : i32 to vector<8x128xi32>
    %234 = arith.cmpi slt, %233, %16 : vector<8x128xi32>
    %235 = arith.select %234, %231, %199 : vector<8x128xi1>, vector<8x128xf32>
    %c6_i32 = arith.constant 6 : i32
    %c8_i32_54 = arith.constant 8 : i32
    %236 = arith.muli %c6_i32, %c8_i32_54 : i32
    %237 = tpu.assume_multiple %236, 8 : i32
    %238 = arith.index_cast %237 : i32 to index
    %c0_55 = arith.constant 0 : index
    %239 = vector.load %arg13[%238, %c0_55] : memref<64x384xf32, #tpu.memory_space<vmem>>, vector<8x384xf32>
    %cst_56 = arith.constant dense<0.000000e+00> : vector<8x384xf32>
    %240 = tpu.matmul %235, %18, %cst_56 {dimension_numbers = #tpu.dot_dimension_numbers<[1], [0], [0], [1], [0, 0, 1, 1], [], []>} : vector<8x128xf32>, vector<128x384xf32>, vector<8x384xf32> -> vector<8x384xf32>
    %241 = vector.extract_strided_slice %239 {offsets = [0, 0], sizes = [8, 128], strides = [1, 1]} : vector<8x384xf32> to vector<8x128xf32>
    %242 = vector.extract_strided_slice %240 {offsets = [0, 0], sizes = [8, 128], strides = [1, 1]} : vector<8x384xf32> to vector<8x128xf32>
    %243 = arith.addf %241, %242 : vector<8x128xf32>
    %244 = arith.negf %243 : vector<8x128xf32>
    %245 = math.exp %244 : vector<8x128xf32>
    %cst_57 = arith.constant 1.000000e+00 : f32
    %246 = vector.broadcast %cst_57 : f32 to vector<8x128xf32>
    %247 = arith.addf %246, %245 : vector<8x128xf32>
    %248 = arith.divf %246, %247 : vector<8x128xf32>
    %249 = vector.extract_strided_slice %239 {offsets = [0, 128], sizes = [8, 128], strides = [1, 1]} : vector<8x384xf32> to vector<8x128xf32>
    %250 = vector.extract_strided_slice %240 {offsets = [0, 128], sizes = [8, 128], strides = [1, 1]} : vector<8x384xf32> to vector<8x128xf32>
    %251 = arith.addf %249, %250 : vector<8x128xf32>
    %252 = arith.negf %251 : vector<8x128xf32>
    %253 = math.exp %252 : vector<8x128xf32>
    %cst_58 = arith.constant 1.000000e+00 : f32
    %254 = vector.broadcast %cst_58 : f32 to vector<8x128xf32>
    %255 = arith.addf %254, %253 : vector<8x128xf32>
    %256 = arith.divf %254, %255 : vector<8x128xf32>
    %257 = vector.extract_strided_slice %239 {offsets = [0, 256], sizes = [8, 128], strides = [1, 1]} : vector<8x384xf32> to vector<8x128xf32>
    %258 = vector.extract_strided_slice %240 {offsets = [0, 256], sizes = [8, 128], strides = [1, 1]} : vector<8x384xf32> to vector<8x128xf32>
    %259 = arith.addf %258, %13 : vector<8x128xf32>
    %260 = arith.mulf %248, %259 : vector<8x128xf32>
    %261 = arith.addf %257, %260 : vector<8x128xf32>
    %262 = math.tanh %261 : vector<8x128xf32>
    %cst_59 = arith.constant 1.000000e+00 : f32
    %263 = vector.broadcast %cst_59 : f32 to vector<8x128xf32>
    %264 = arith.subf %263, %256 : vector<8x128xf32>
    %265 = arith.mulf %264, %262 : vector<8x128xf32>
    %266 = arith.mulf %256, %235 : vector<8x128xf32>
    %267 = arith.addf %265, %266 : vector<8x128xf32>
    %268 = arith.addi %17, %c6_i32 : i32
    %269 = vector.broadcast %268 : i32 to vector<8x128xi32>
    %270 = arith.cmpi slt, %269, %16 : vector<8x128xi32>
    %271 = arith.select %270, %267, %235 : vector<8x128xi1>, vector<8x128xf32>
    %c7_i32 = arith.constant 7 : i32
    %c8_i32_60 = arith.constant 8 : i32
    %272 = arith.muli %c7_i32, %c8_i32_60 : i32
    %273 = tpu.assume_multiple %272, 8 : i32
    %274 = arith.index_cast %273 : i32 to index
    %c0_61 = arith.constant 0 : index
    %275 = vector.load %arg13[%274, %c0_61] : memref<64x384xf32, #tpu.memory_space<vmem>>, vector<8x384xf32>
    %cst_62 = arith.constant dense<0.000000e+00> : vector<8x384xf32>
    %276 = tpu.matmul %271, %18, %cst_62 {dimension_numbers = #tpu.dot_dimension_numbers<[1], [0], [0], [1], [0, 0, 1, 1], [], []>} : vector<8x128xf32>, vector<128x384xf32>, vector<8x384xf32> -> vector<8x384xf32>
    %277 = vector.extract_strided_slice %275 {offsets = [0, 0], sizes = [8, 128], strides = [1, 1]} : vector<8x384xf32> to vector<8x128xf32>
    %278 = vector.extract_strided_slice %276 {offsets = [0, 0], sizes = [8, 128], strides = [1, 1]} : vector<8x384xf32> to vector<8x128xf32>
    %279 = arith.addf %277, %278 : vector<8x128xf32>
    %280 = arith.negf %279 : vector<8x128xf32>
    %281 = math.exp %280 : vector<8x128xf32>
    %cst_63 = arith.constant 1.000000e+00 : f32
    %282 = vector.broadcast %cst_63 : f32 to vector<8x128xf32>
    %283 = arith.addf %282, %281 : vector<8x128xf32>
    %284 = arith.divf %282, %283 : vector<8x128xf32>
    %285 = vector.extract_strided_slice %275 {offsets = [0, 128], sizes = [8, 128], strides = [1, 1]} : vector<8x384xf32> to vector<8x128xf32>
    %286 = vector.extract_strided_slice %276 {offsets = [0, 128], sizes = [8, 128], strides = [1, 1]} : vector<8x384xf32> to vector<8x128xf32>
    %287 = arith.addf %285, %286 : vector<8x128xf32>
    %288 = arith.negf %287 : vector<8x128xf32>
    %289 = math.exp %288 : vector<8x128xf32>
    %cst_64 = arith.constant 1.000000e+00 : f32
    %290 = vector.broadcast %cst_64 : f32 to vector<8x128xf32>
    %291 = arith.addf %290, %289 : vector<8x128xf32>
    %292 = arith.divf %290, %291 : vector<8x128xf32>
    %293 = vector.extract_strided_slice %275 {offsets = [0, 256], sizes = [8, 128], strides = [1, 1]} : vector<8x384xf32> to vector<8x128xf32>
    %294 = vector.extract_strided_slice %276 {offsets = [0, 256], sizes = [8, 128], strides = [1, 1]} : vector<8x384xf32> to vector<8x128xf32>
    %295 = arith.addf %294, %13 : vector<8x128xf32>
    %296 = arith.mulf %284, %295 : vector<8x128xf32>
    %297 = arith.addf %293, %296 : vector<8x128xf32>
    %298 = math.tanh %297 : vector<8x128xf32>
    %cst_65 = arith.constant 1.000000e+00 : f32
    %299 = vector.broadcast %cst_65 : f32 to vector<8x128xf32>
    %300 = arith.subf %299, %292 : vector<8x128xf32>
    %301 = arith.mulf %300, %298 : vector<8x128xf32>
    %302 = arith.mulf %292, %271 : vector<8x128xf32>
    %303 = arith.addf %301, %302 : vector<8x128xf32>
    %304 = arith.addi %17, %c7_i32 : i32
    %305 = vector.broadcast %304 : i32 to vector<8x128xi32>
    %306 = arith.cmpi slt, %305, %16 : vector<8x128xi32>
    %307 = arith.select %306, %303, %271 : vector<8x128xi1>, vector<8x128xf32>
    %c8_i32_66 = arith.constant 8 : i32
    %c0_67 = arith.constant 0 : index
    %c0_68 = arith.constant 0 : index
    %308 = vector.load %arg12[%c0_67, %c0_68] : memref<8x128xf32, #tpu.memory_space<vmem>>, vector<8x128xf32>
    tpu.vector_store %arg12[%c0_67, %c0_68], %307 {strides = array<i32>} : memref<8x128xf32, #tpu.memory_space<vmem>>, vector<8x128xf32>,
    %c0_i32_69 = arith.constant 0 : i32
    %309 = arith.cmpi eq, %arg1, %c0_i32_69 : i32
    %310 = arith.extui %309 : i1 to i32
    %c0_i32_70 = arith.constant 0 : i32
    %311 = arith.cmpi ne, %310, %c0_i32_70 : i32
    scf.if %311 {
      %c0_71 = arith.constant 0 : index
      %c0_72 = arith.constant 0 : index
      %312 = vector.load %arg12[%c0_71, %c0_72] : memref<8x128xf32, #tpu.memory_space<vmem>>, vector<8x128xf32>
      %c0_73 = arith.constant 0 : index
      %c0_74 = arith.constant 0 : index
      %313 = vector.load %arg9[%c0_73, %c0_74] : memref<128x128xf32, #tpu.memory_space<vmem>>, vector<128x128xf32>
      %cst_75 = arith.constant dense<0.000000e+00> : vector<8x128xf32>
      %314 = tpu.matmul %312, %313, %cst_75 {dimension_numbers = #tpu.dot_dimension_numbers<[1], [0], [0], [1], [0, 0, 1, 1], [], []>} : vector<8x128xf32>, vector<128x128xf32>, vector<8x128xf32> -> vector<8x128xf32>
      %c0_76 = arith.constant 0 : index
      %c0_77 = arith.constant 0 : index
      %315 = vector.load %arg10[%c0_76, %c0_77] : memref<1x128xf32, #tpu.memory_space<vmem>>, vector<1x128xf32>
      %316 = vector.broadcast %315 : vector<1x128xf32> to vector<8x128xf32>
      %317 = arith.addf %314, %316 : vector<8x128xf32>
      %c0_78 = arith.constant 0 : index
      %c0_79 = arith.constant 0 : index
      %318 = vector.load %arg11[%c0_78, %c0_79] : memref<8x128xf32, #tpu.memory_space<vmem>>, vector<8x128xf32>
      tpu.vector_store %arg11[%c0_78, %c0_79], %317 {strides = array<i32>} : memref<8x128xf32, #tpu.memory_space<vmem>>, vector<8x128xf32>,
    } else {
    }
    return
  }
  func.func @transform_0(%arg0: i32, %arg1: i32) -> (i32, i32) {
    %c0_i32 = arith.constant 0 : i32
    %c0_i32_0 = arith.constant 0 : i32
    return %arg0, %c0_i32 : i32, i32
  }
  func.func @transform_1(%arg0: i32, %arg1: i32) -> (i32, i32) {
    %c0_i32 = arith.constant 0 : i32
    %c0_i32_0 = arith.constant 0 : i32
    return %arg0, %c0_i32 : i32, i32
  }
  func.func @transform_2(%arg0: i32, %arg1: i32) -> (i32, i32, i32) {
    %c0_i32 = arith.constant 0 : i32
    %c0_i32_0 = arith.constant 0 : i32
    return %arg1, %arg0, %c0_i32 : i32, i32, i32
  }
  func.func @transform_3(%arg0: i32, %arg1: i32) -> (i32, i32) {
    %c0_i32 = arith.constant 0 : i32
    %c0_i32_0 = arith.constant 0 : i32
    %c0_i32_1 = arith.constant 0 : i32
    return %c0_i32, %c0_i32_0 : i32, i32
  }
  func.func @transform_4(%arg0: i32, %arg1: i32) -> (i32, i32) {
    %c0_i32 = arith.constant 0 : i32
    %c0_i32_0 = arith.constant 0 : i32
    %c0_i32_1 = arith.constant 0 : i32
    return %c0_i32, %c0_i32_0 : i32, i32
  }
  func.func @transform_5(%arg0: i32, %arg1: i32) -> (i32, i32) {
    %c0_i32 = arith.constant 0 : i32
    %c0_i32_0 = arith.constant 0 : i32
    %c0_i32_1 = arith.constant 0 : i32
    return %c0_i32, %c0_i32_0 : i32, i32
  }
  func.func @transform_6(%arg0: i32, %arg1: i32) -> (i32, i32) {
    %c0_i32 = arith.constant 0 : i32
    %c0_i32_0 = arith.constant 0 : i32
    %c0_i32_1 = arith.constant 0 : i32
    return %c0_i32, %c0_i32_0 : i32, i32
  }
  func.func @transform_7(%arg0: i32, %arg1: i32) -> (i32, i32) {
    %c0_i32 = arith.constant 0 : i32
    %c0_i32_0 = arith.constant 0 : i32
    %c0_i32_1 = arith.constant 0 : i32
    return %c0_i32, %c0_i32_0 : i32, i32
  }
  func.func @transform_8(%arg0: i32, %arg1: i32) -> (i32, i32) {
    %c0_i32 = arith.constant 0 : i32
    %c0_i32_0 = arith.constant 0 : i32
    %c0_i32_1 = arith.constant 0 : i32
    return %c0_i32, %c0_i32_0 : i32, i32
  }
  func.func @transform_9(%arg0: i32, %arg1: i32) -> (i32, i32) {
    %c0_i32 = arith.constant 0 : i32
    %c0_i32_0 = arith.constant 0 : i32
    return %arg0, %c0_i32 : i32, i32
  }
}

</mosaic_0001>

<bundles_post_ra>
// kernel: tpu_custom_call.1
= control target key start
LH: loop header
LB: loop body
LE: loop exit
PB: predicated region body
PF: predicated region fallthrough
CT: control target
= control target key end

     0   :  { %14 = vsyncpa [#allocation5], 0  ;;  %s3800_s0 = inlined_call_operand.vmem [shape: s32[8,1], index: 0, kind: input, shape index: {}]   ;;  %s3801_s1 = inlined_call_operand.vmem [shape: f32[8,128], index: 1, kind: input, shape index: {}]   ;;  %s3802_s2 = inlined_call_operand.hbm [shape: f32[8,8,128], index: 2, kind: input, shape index: {}]   ;;  %s3803_s3 = inlined_call_operand.hbm [shape: f32[128,384], index: 3, kind: input, shape index: {}]   ;;  %s3804_s4 = inlined_call_operand.hbm [shape: f32[128,384], index: 4, kind: input, shape index: {}]   ;;  %s3805_s5 = inlined_call_operand.vmem [shape: f32[1,384], index: 5, kind: input, shape index: {}]   ;;  %s3806_s6 = inlined_call_operand.vmem [shape: f32[1,128], index: 6, kind: input, shape index: {}]   ;;  %s3807_s7 = inlined_call_operand.hbm [shape: f32[128,128], index: 7, kind: input, shape index: {}]   ;;  %s3808_s8 = inlined_call_operand.vmem [shape: f32[1,128], index: 8, kind: input, shape index: {}]   ;;  %s3809_s9 = inlined_call_operand.hbm [shape: f32[8,128], index: 9, kind: output, shape index: {}]  }
   0x1   :  { %15 = vsyncpa [#allocation8], 0 }
   0x2   :  { %16 = vsyncpa [#allocation11], 0 }
   0x3   :  { %17 = vsyncpa [#allocation6], 0  ;;  %s2788_s30 = smov [#allocation7]  }
   0x4   :  { %s39_s10 = sshll.u32 %s2788_s30, 4  ;;  %s40_s10 = int_to_ptr.vmem [resolvable:$true] %s39_s10 }
   0x5   :  { %s2688_s11 = scalar_lea.vmem %s40_s10, 6144  ;;  %p2693_p1 = scmp.lt.s32.totalorder %s40_s10, %s40_s10 }
   0x6   :  { %p2689_p0 = scmp.ne.s32.totalorder %s40_s10, %s2688_s11  ;;  %p2694_p2 = scmp.lt.s32.totalorder %s2688_s11, %s2688_s11 }
   0x8   :  { %p2695_p3 = por %p2694_p2, %p2693_p1 }
   0xa   :  { %p2696_p4 = pnand %p2695_p3, %p2689_p0 }
   0xc   :  { %2699 = shalt.err (!%p2696_p4)
}
   0xd   :  { %s2789_s12 = smov 384   ;;  %s2790_s13 = smov 24  }
   0xe   :  { %45 = dma.hbm_to_vmem [thread:$0]  %s3803_s3, 6144, %s40_s10, [#allocation8], %s2789_s12, %s2789_s12, %s2790_s13  }
   0xf   :  { %s2791_s16 = smov [#allocation4]  }
  0x10   :  { %s27_s17 = sshll.u32 %s2791_s16, 4  ;;  %s28_s17 = int_to_ptr.vmem [resolvable:$true] %s27_s17 }
  0x11   :  { %s2708_s18 = scalar_lea.vmem %s28_s17, 1024  ;;  %p2713_p6 = scmp.lt.s32.totalorder %s28_s17, %s28_s17 }
  0x12   :  { %p2709_p5 = scmp.ne.s32.totalorder %s28_s17, %s2708_s18  ;;  %p2714_p7 = scmp.lt.s32.totalorder %s2708_s18, %s2708_s18 }
  0x14   :  { %p2715_p8 = por %p2714_p7, %p2713_p6 }
  0x16   :  { %p2716_p9 = pnand %p2715_p8, %p2709_p5 }
  0x18   :  { %2719 = shalt.err (!%p2716_p9)
}
  0x19   :  { %s2792_s19 = smov 128   ;;  %s2793_s20 = smov 8  }
  0x1a   :  { %33 = dma.hbm_to_vmem [thread:$0]  %s3802_s2, 1024, %s28_s17, [#allocation5], %s2792_s19, %s2792_s19, %s2793_s20  }
  0x1b   :  { %s2794_s23 = smov [#allocation9]   ;;  %s2795_s25 = smov [#allocation10]  }
  0x1c   :  { %s51_s24 = sshll.u32 %s2794_s23, 4  ;;  %s67_s3 = sshll.u32 %s2795_s25, 4  ;;  %s52_s24 = int_to_ptr.vmem [resolvable:$true] %s51_s24  ;;  %s68_s3 = int_to_ptr.vmem [resolvable:$true] %s67_s3 }
  0x1d   :  { %s2728_s26 = scalar_lea.vmem %s52_s24, 6144  ;;  %p2733_p11 = scmp.lt.s32.totalorder %s52_s24, %s52_s24 }
  0x1e   :  { %p2729_p10 = scmp.ne.s32.totalorder %s52_s24, %s2728_s26  ;;  %p2734_p12 = scmp.lt.s32.totalorder %s2728_s26, %s2728_s26 }
  0x20   :  { %p2735_p13 = por %p2734_p12, %p2733_p11 }
  0x22   :  { %p2736_p0 = pnand %p2735_p13, %p2729_p10 }
  0x24   :  { %2739 = shalt.err (!%p2736_p0)
}
  0x25   :  { %57 = dma.hbm_to_vmem [thread:$0]  %s3804_s4, 6144, %s52_s24, [#allocation8], %s2789_s12, %s2789_s12, %s2790_s13  }
  0x26   :  { %s2748_s2 = scalar_lea.vmem %s68_s3, 2048  ;;  %p2753_p2 = scmp.lt.s32.totalorder %s68_s3, %s68_s3 }
  0x27   :  { %p2749_p1 = scmp.ne.s32.totalorder %s68_s3, %s2748_s2  ;;  %p2754_p3 = scmp.lt.s32.totalorder %s2748_s2, %s2748_s2 }
  0x29   :  { %p2755_p4 = por %p2754_p3, %p2753_p2 }
  0x2b   :  { %p2756_p5 = pnand %p2755_p4, %p2749_p1 }
  0x2d   :  { %2759 = shalt.err (!%p2756_p5)
}
  0x2e   :  { %73 = dma.hbm_to_vmem [thread:$0]  %s3807_s7, 2048, %s68_s3, [#allocation11], %s2792_s19, %s2792_s19, %s2793_s20  }
  0x2f   :  { %2780 = dma.done.wait [#allocation5], 1024  }
  0x30   :  { %2781 = vsyncadd [#allocation5], 4294966272 }
  0x31   :  { %2782 = dma.done.wait [#allocation8], 12288  }
  0x32   :  { %2783 = vsyncadd [#allocation8], 4294955008 }
  0x33   :  { %2784 = dma.done.wait [#allocation11], 2048  }
  0x34   :  { %2785 = vsyncadd [#allocation11], 4294965248  ;;  %v3810_v0 = vmov 0.0   ;;  %v2797_v1 = vmov 0   ;;  %v148_v2 = vld [vmem:[#allocation7 + $0x170] sm:$0xff]  ;;  %v147_v3 = vld [vmem:[#allocation7 + $0x168] sm:$0xff] }
  0x35   :  { %231 = vmatprep.mubr.f32.mxu0 %v3810_v0  ;;  %2550 = vset.pattern.permute.xlu0 %v2797_v1  ;;  %v145_v4 = vld [vmem:[#allocation7 + $0x158] sm:$0xff]  ;;  %v144_v5 = vld [vmem:[#allocation7 + $0x150] sm:$0xff]  ;;  %v142_v6 = vld [vmem:[#allocation7 + $0x140] sm:$0xff]  ;;  %vm2798_vm0 = vmmov 0   ;;  %s2799_s16 = smov [#allocation12]  }
  0x36   :  { %167 = vmatprep.subr.mxu0 %v148_v2  ;;  %v141_v7 = vld [vmem:[#allocation7 + $0x138] sm:$0xff]  ;;  %v139_v8 = vld [vmem:[#allocation7 + $0x128] sm:$0xff]  ;;  %v138_v9 = vld [vmem:[#allocation7 + $0x120] sm:$0xff]  ;;  %s1958_s17 = sshll.u32 %s2799_s16, 4  ;;  %s1959_s17 = int_to_ptr.vmem [resolvable:$true] %s1958_s17 }
  0x37   :  { %168 = vmatpush1.msra.mxu0 %v147_v3  ;;  %v136_v10 = vld [vmem:[#allocation7 + $0x110] sm:$0xff]  ;;  %v135_v11 = vld [vmem:[#allocation7 + $0x108] sm:$0xff]  ;;  %v133_v12 = vld [vmem:[#allocation7 + $0xf8] sm:$0xff]  ;;  %s2760_s18 = scalar_lea.vmem %s1959_s17, 128  ;;  %p2765_p7 = scmp.lt.s32.totalorder %s1959_s17, %s1959_s17 }
  0x38   :  { %169 = vmatprep.subr.mxu0 %v145_v4  ;;  %v132_v13 = vld [vmem:[#allocation7 + $0xf0] sm:$0xff]  ;;  %v130_v14 = vld [vmem:[#allocation7 + $0xe0] sm:$0xff]  ;;  %v149_v15 = vld [vmem:[#allocation7 + $0x178] sm:$0xff]  ;;  %p2761_p6 = scmp.ne.s32.totalorder %s1959_s17, %s2760_s18  ;;  %p2766_p8 = scmp.lt.s32.totalorder %s2760_s18, %s2760_s18 }
  0x39   :  { %170 = vmatpush1.msra.mxu0 %v144_v5  ;;  %v129_v16 = vld [vmem:[#allocation7 + $0xd8] sm:$0xff]  ;;  %2179 = vmatprep.subr.mxu1 %v149_v15  ;;  %v146_v17 = vld [vmem:[#allocation7 + $0x160] sm:$0xff]  ;;  %v127_v18 = vld [vmem:[#allocation7 + $0xc8] sm:$0xff] }
  0x3a   :  { %171 = vmatprep.subr.mxu0 %v142_v6  ;;  %2180 = vmatpush3.msra.mxu1 %v149_v15  ;;  %v143_v19 = vld [vmem:[#allocation7 + $0x148] sm:$0xff]  ;;  %v126_v20 = vld [vmem:[#allocation7 + $0xc0] sm:$0xff]  ;;  %v124_v21 = vld [vmem:[#allocation7 + $0xb0] sm:$0xff]  ;;  %p2767_p9 = por %p2766_p8, %p2765_p7 }
  0x3b   :  { %172 = vmatpush1.msra.mxu0 %v141_v7  ;;  %2181 = vmatprep.subr.mxu1 %v146_v17  ;;  %v140_v22 = vld [vmem:[#allocation7 + $0x130] sm:$0xff]  ;;  %v123_v23 = vld [vmem:[#allocation7 + $0xa8] sm:$0xff]  ;;  %v121_v24 = vld [vmem:[#allocation7 + $0x98] sm:$0xff] }
  0x3c   :  { %173 = vmatprep.subr.mxu0 %v139_v8  ;;  %2182 = vmatpush3.msra.mxu1 %v146_v17  ;;  %v137_v25 = vld [vmem:[#allocation7 + $0x118] sm:$0xff]  ;;  %v120_v26 = vld [vmem:[#allocation7 + $0x90] sm:$0xff]  ;;  %v118_v27 = vld [vmem:[#allocation7 + $0x80] sm:$0xff]  ;;  %p2768_p10 = pnand %p2767_p9, %p2761_p6 }
  0x3d   :  { %174 = vmatpush1.msra.mxu0 %v138_v9  ;;  %2183 = vmatprep.subr.mxu1 %v143_v19  ;;  %v134_v28 = vld [vmem:[#allocation7 + $0x100] sm:$0xff]  ;;  %v117_v29 = vld [vmem:[#allocation7 + $0x78] sm:$0xff]  ;;  %v115_v30 = vld [vmem:[#allocation7 + $0x68] sm:$0xff] }
  0x3e   :  { %175 = vmatprep.subr.mxu0 %v136_v10  ;;  %2184 = vmatpush3.msra.mxu1 %v143_v19  ;;  %v131_v31 = vld [vmem:[#allocation7 + $0xe8] sm:$0xff]  ;;  %v114_v32 = vld [vmem:[#allocation7 + $0x60] sm:$0xff]  ;;  %v112_v33 = vld [vmem:[#allocation7 + $0x50] sm:$0xff] }
  0x3f   :  { %176 = vmatpush1.msra.mxu0 %v135_v11  ;;  %2185 = vmatprep.subr.mxu1 %v140_v22  ;;  %v128_v34 = vld [vmem:[#allocation7 + $0xd0] sm:$0xff]  ;;  %v111_v35 = vld [vmem:[#allocation7 + $0x48] sm:$0xff]  ;;  %v109_v36 = vld [vmem:[#allocation7 + $0x38] sm:$0xff] }
  0x40   :  { %177 = vmatprep.subr.mxu0 %v133_v12  ;;  %2186 = vmatpush3.msra.mxu1 %v140_v22  ;;  %v125_v37 = vld [vmem:[#allocation7 + $0xb8] sm:$0xff]  ;;  %v108_v38 = vld [vmem:[#allocation7 + $0x30] sm:$0xff]  ;;  %v106_v39 = vld [vmem:[#allocation7 + $0x20] sm:$0xff] }
  0x41   :  { %178 = vmatpush1.msra.mxu0 %v132_v13  ;;  %2187 = vmatprep.subr.mxu1 %v137_v25  ;;  %v122_v40 = vld [vmem:[#allocation7 + $0xa0] sm:$0xff]  ;;  %v105_v41 = vld [vmem:[#allocation7 + $0x18] sm:$0xff]  ;;  %v103_v42 = vld [vmem:[#allocation7 + $0x8] sm:$0xff] }
  0x42   :  { %179 = vmatprep.subr.mxu0 %v130_v14  ;;  %2188 = vmatpush3.msra.mxu1 %v137_v25  ;;  %v119_v43 = vld [vmem:[#allocation7 + $0x88] sm:$0xff]  ;;  %v102_v44 = vld [vmem:[#allocation7] sm:$0xff]  ;;  %v2871_v46 = vld [vmem:[#allocation9 + $0x170] sm:$0xff] }
  0x43   :  { %180 = vmatpush1.msra.mxu0 %v129_v16  ;;  %2189 = vmatprep.subr.mxu1 %v134_v28  ;;  %v2869_v45 = vld [vmem:[#allocation4] sm:$0xff]  ;;  %3831 = vst [vmem:[#allocation17_spill] sm:$0xff] %v2871_v46  ;;  %v2873_v47 = vld [vmem:[#allocation9 + $0x168] sm:$0xff]  ;;  %v2875_v48 = vld [vmem:[#allocation9 + $0x158] sm:$0xff] }
  0x44   :  { %181 = vmatprep.subr.mxu0 %v127_v18  ;;  %2190 = vmatpush3.msra.mxu1 %v134_v28  ;;  %v116_v49 = vld [vmem:[#allocation7 + $0x70] sm:$0xff]  ;;  %v2883_v51 = vld [vmem:[#allocation4 + $0x8] sm:$0xff]  ;;  %v2885_v52 = vld [vmem:[#allocation9 + $0x140] sm:$0xff] }
  0x45   :  { %182 = vmatpush1.msra.mxu0 %v126_v20  ;;  %2191 = vmatprep.subr.mxu1 %v131_v31  ;;  %v2879_v50 = vld [vmem:[#allocation9 + $0x150] sm:$0xff]  ;;  %v2888_v53 = vld [vmem:[#allocation9 + $0x138] sm:$0xff]  ;;  %v2891_v54 = vld [vmem:[#allocation9 + $0x128] sm:$0xff] }
  0x46   :  { %183 = vmatprep.subr.mxu0 %v124_v21  ;;  %2192 = vmatpush3.msra.mxu1 %v131_v31  ;;  %v113_v55 = vld [vmem:[#allocation7 + $0x58] sm:$0xff]  ;;  %v2895_v56 = vld [vmem:[#allocation9 + $0x120] sm:$0xff]  ;;  %v2899_v57 = vld [vmem:[#allocation4 + $0x10] sm:$0xff] }
  0x47   :  { %184 = vmatpush1.msra.mxu0 %v123_v23  ;;  %2193 = vmatprep.subr.mxu1 %v128_v34  ;;  %v2901_v58 = vld [vmem:[#allocation9 + $0x110] sm:$0xff]  ;;  %v2904_v59 = vld [vmem:[#allocation9 + $0x108] sm:$0xff]  ;;  %v2907_v60 = vld [vmem:[#allocation9 + $0xf8] sm:$0xff] }
  0x48   :  { %185 = vmatprep.subr.mxu0 %v121_v24  ;;  %2194 = vmatpush3.msra.mxu1 %v128_v34  ;;  %v110_v61 = vld [vmem:[#allocation7 + $0x40] sm:$0xff]  ;;  %v2911_v62 = vld [vmem:[#allocation9 + $0xf0] sm:$0xff]  ;;  %v2915_v63 = vld [vmem:[#allocation4 + $0x18] sm:$0xff] }
  0x49   :  { %186 = vmatpush1.msra.mxu0 %v120_v26  ;;  %2195 = vmatprep.subr.mxu1 %v125_v37  ;;  %v2917_v1 = vld [vmem:[#allocation9 + $0xe0] sm:$0xff]  ;;  %v2920_v2 = vld [vmem:[#allocation9 + $0xd8] sm:$0xff]  ;;  %v2923_v3 = vld [vmem:[#allocation9 + $0xc8] sm:$0xff] }
  0x4a   :  { %187 = vmatprep.subr.mxu0 %v118_v27  ;;  %2196 = vmatpush3.msra.mxu1 %v125_v37  ;;  %v107_v4 = vld [vmem:[#allocation7 + $0x28] sm:$0xff]  ;;  %v2927_v5 = vld [vmem:[#allocation9 + $0xc0] sm:$0xff]  ;;  %v2933_v7 = vld [vmem:[#allocation9 + $0xb0] sm:$0xff] }
  0x4b   :  { %188 = vmatpush1.msra.mxu0 %v117_v29  ;;  %2197 = vmatprep.subr.mxu1 %v122_v40  ;;  %v2931_v6 = vld [vmem:[#allocation4 + $0x20] sm:$0xff]  ;;  %v2936_v8 = vld [vmem:[#allocation9 + $0xa8] sm:$0xff]  ;;  %v2939_v9 = vld [vmem:[#allocation9 + $0x98] sm:$0xff] }
  0x4c   :  { %189 = vmatprep.subr.mxu0 %v115_v30  ;;  %2198 = vmatpush3.msra.mxu1 %v122_v40  ;;  %v104_v10 = vld [vmem:[#allocation7 + $0x10] sm:$0xff]  ;;  %v2947_v12 = vld [vmem:[#allocation4 + $0x28] sm:$0xff]  ;;  %v2949_v13 = vld [vmem:[#allocation9 + $0x80] sm:$0xff] }
  0x4d   :  { %190 = vmatpush1.msra.mxu0 %v114_v32  ;;  %2199 = vmatprep.subr.mxu1 %v119_v43  ;;  %v2943_v11 = vld [vmem:[#allocation9 + $0x90] sm:$0xff]  ;;  %v2952_v14 = vld [vmem:[#allocation9 + $0x78] sm:$0xff]  ;;  %v2955_v15 = vld [vmem:[#allocation9 + $0x68] sm:$0xff] }
  0x4e   :  { %191 = vmatprep.subr.mxu0 %v112_v33  ;;  %2200 = vmatpush3.msra.mxu1 %v119_v43  ;;  %v2959_v16 = vld [vmem:[#allocation9 + $0x60] sm:$0xff]  ;;  %v100_v17 = vld [vmem:[#allocation4 + $0x30] sm:$0xff]  ;;  %v2966_v19 = vld [vmem:[#allocation9 + $0x48] sm:$0xff] }
  0x4f   :  { %192 = vmatpush1.msra.mxu0 %v111_v35  ;;  %2201 = vmatprep.subr.mxu1 %v116_v49  ;;  %v2963_v18 = vld [vmem:[#allocation9 + $0x50] sm:$0xff]  ;;  %v2970_v20 = vld [vmem:[#allocation9 + $0x38] sm:$0xff]  ;;  %v2980_v24 = vld [vmem:[#allocation9 + $0x20] sm:$0xff] }
  0x50   :  { %193 = vmatprep.subr.mxu0 %v109_v36  ;;  %2202 = vmatpush3.msra.mxu1 %v116_v49  ;;  %v2974_v21 = vld [vmem:[#allocation9 + $0x30] sm:$0xff]  ;;  %v2976_v22 = vld [vmem:[#allocation9 + $0x178] sm:$0xff]  ;;  %3832 = vst [vmem:[#allocation18_spill] sm:$0xff] %v2980_v24  ;;  %v2987_v26 = vld [vmem:[#allocation9 + $0x8] sm:$0xff] }
  0x51   :  { %194 = vmatpush1.msra.mxu0 %v108_v38  ;;  %2203 = vmatprep.subr.mxu1 %v113_v55  ;;  %v101_v23 = vld [vmem:[#allocation4 + $0x38] sm:$0xff]  ;;  %3834 = vst [vmem:[#allocation20_spill] sm:$0xff] %v2987_v26  ;;  %v2991_v27 = vld [vmem:[#allocation9] sm:$0xff]  ;;  %v3004_v30 = vld [vmem:[#allocation9 + $0x148] sm:$0xff] }
  0x52   :  { %195 = vmatprep.subr.mxu0 %v106_v39  ;;  %2204 = vmatpush3.msra.mxu1 %v113_v55  ;;  %v2983_v25 = vld [vmem:[#allocation9 + $0x18] sm:$0xff]  ;;  %3835 = vst [vmem:[#allocation21_spill] sm:$0xff] %v2991_v27  ;;  %v2993_v28 = vld [vmem:[#allocation9 + $0x160] sm:$0xff]  ;;  %v3010_v31 = vld [vmem:[#allocation9 + $0x130] sm:$0xff] }
  0x53   :  { %196 = vmatpush1.msra.mxu0 %v105_v41  ;;  %2205 = vmatprep.subr.mxu1 %v110_v61  ;;  %3833 = vst [vmem:[#allocation19_spill] sm:$0xff] %v2983_v25  ;;  %v3000_v29 = vld [vmem:[%s3801_s1] sm:$0xff]  ;;  %v3018_v33 = vld [vmem:[#allocation9 + $0x118] sm:$0xff]  ;;  %v3029_v35 = vld [vmem:[#allocation9 + $0xe8] sm:$0xff] }
  0x54   :  { %197 = vmatprep.subr.mxu0 %v103_v42  ;;  %2206 = vmatpush3.msra.mxu1 %v110_v61  ;;  %v416_v32 = vld [vmem:[%s3800_s0] sm:$0xff]  ;;  %v3034_v36 = vld [vmem:[#allocation9 + $0xd0] sm:$0xff]  ;;  %v3040_v37 = vld [vmem:[#allocation9 + $0xb8] sm:$0xff] }
  0x55   :  { %198 = vmatpush1.msra.mxu0 %v102_v44  ;;  %2207 = vmatprep.subr.mxu1 %v107_v4  ;;  %v3024_v34 = vld [vmem:[#allocation9 + $0x100] sm:$0xff]  ;;  %v3052_v39 = vld [vmem:[#allocation9 + $0x88] sm:$0xff]  ;;  %v3058_v40 = vld [vmem:[#allocation9 + $0x70] sm:$0xff] }
  0x56   :  { %232 = vmatmul.mubr.f32.vlgmr.msra.gmra.mxu0 %v2869_v45  ;;  %476 = vmatprep.subr.mxu0 %v2871_v46  ;;  %v3046_v38 = vld [vmem:[#allocation9 + $0xa0] sm:$0xff]  ;;  %v3064_v41 = vld [vmem:[#allocation9 + $0x58] sm:$0xff]  ;;  %v3076_v43 = vld [vmem:[#allocation9 + $0x28] sm:$0xff] }
  0x57   :  { %477 = vmatpush1.msra.mxu0 %v2873_v47  ;;  %237 = vmatprep.mubr.f32.mxu0 %v3810_v0  ;;  %v3070_v42 = vld [vmem:[#allocation9 + $0x40] sm:$0xff]  ;;  %3836 = vst [vmem:[#allocation22_spill] sm:$0xff] %v3076_v43  ;;  %v3082_v44 = vld [vmem:[#allocation9 + $0x10] sm:$0xff] }
  0x58   :  { %478 = vmatprep.subr.mxu0 %v2875_v48  ;;  %2208 = vmatpush3.msra.mxu1 %v107_v4  ;;  %3837 = vst [vmem:[#allocation23_spill] sm:$0xff] %v3082_v44  ;;  %v150_v55 = vld [vmem:[%s3805_s5] sm:$0x7] }
  0x59   :  { %479 = vmatpush1.msra.mxu0 %v2879_v50  ;;  %2209 = vmatprep.subr.mxu1 %v104_v10 }
  0x5a   :  { %238 = vmatmul.mubr.f32.gmra.mxu0 %v2883_v51  ;;  %480 = vmatprep.subr.mxu0 %v2885_v52 }
  0x5b   :  { %481 = vmatpush1.msra.mxu0 %v2888_v53  ;;  %243 = vmatprep.mubr.f32.mxu0 %v3810_v0 }
  0x5c   :  { %482 = vmatprep.subr.mxu0 %v2891_v54  ;;  %2210 = vmatpush3.msra.mxu1 %v104_v10 }
  0x5d   :  { %483 = vmatpush1.msra.mxu0 %v2895_v56  ;;  %2211 = vmatprep.mubr.f32.mxu1 %v2869_v45  ;;  %v152_v45 = vlaneseq }
  0x5e   :  { %244 = vmatmul.mubr.f32.gmra.mxu0 %v2899_v57  ;;  %484 = vmatprep.subr.mxu0 %v2901_v58 }
  0x5f   :  { %485 = vmatpush1.msra.mxu0 %v2904_v59  ;;  %249 = vmatprep.mubr.f32.mxu0 %v3810_v0  ;;  %v153_v49 = vshrl.u32 %v152_v45, 7 }
  0x60   :  { %486 = vmatprep.subr.mxu0 %v2907_v60  ;;  %2223 = vmatprep.subr.mxu1 %v3810_v0 }
  0x61   :  { %487 = vmatpush1.msra.mxu0 %v2911_v62  ;;  %2212 = vmatmul.mubr.f32.vlgmr.msra.gmra.mxu1 %v2883_v51  ;;  %v154_v51 = vsub.s32 0, %v153_v49  ;;  %v158_v61 = vsub.s32 1, %v153_v49 }
  0x62   :  { %250 = vmatmul.mubr.f32.gmra.mxu0 %v2915_v63  ;;  %488 = vmatprep.subr.mxu0 %v2917_v1 }
  0x63   :  { %489 = vmatpush1.msra.mxu0 %v2920_v2  ;;  %255 = vmatprep.mubr.f32.mxu0 %v3810_v0  ;;  %v155_v4 = vrot.slane %v150_v55, %v154_v51  ;;  %v159_v10 = vrot.slane %v150_v55, %v158_v61 }
  0x64   :  { %490 = vmatprep.subr.mxu0 %v2923_v3  ;;  %2224 = vmatpush3.msra.mxu1 %v2976_v22 }
  0x65   :  { %491 = vmatpush1.msra.mxu0 %v2927_v5  ;;  %2225 = vmatprep.subr.mxu1 %v3810_v0 }
  0x66   :  { %256 = vmatmul.mubr.f32.gmra.mxu0 %v2931_v6  ;;  %492 = vmatprep.subr.mxu0 %v2933_v7 }
  0x67   :  { %493 = vmatpush1.msra.mxu0 %v2936_v8  ;;  %261 = vmatprep.mubr.f32.mxu0 %v3810_v0 }
  0x68   :  { %494 = vmatprep.subr.mxu0 %v2939_v9  ;;  %2226 = vmatpush3.msra.mxu1 %v2993_v28 }
  0x69   :  { %495 = vmatpush1.msra.mxu0 %v2943_v11  ;;  %2227 = vmatprep.subr.mxu1 %v3810_v0 }
  0x6a   :  { %262 = vmatmul.mubr.f32.gmra.mxu0 %v2947_v12  ;;  %496 = vmatprep.subr.mxu0 %v2949_v13 }
  0x6b   :  { %497 = vmatpush1.msra.mxu0 %v2952_v14  ;;  %267 = vmatprep.mubr.f32.mxu0 %v3810_v0 }
  0x6c   :  { %498 = vmatprep.subr.mxu0 %v2955_v15  ;;  %2228 = vmatpush3.msra.mxu1 %v3004_v30 }
  0x6d   :  { %499 = vmatpush1.msra.mxu0 %v2959_v16  ;;  %2214 = vmatprep.mubr.f32.mxu1 %v2899_v57 }
  0x6e   :  { %268 = vmatmul.mubr.f32.gmra.mxu0 %v100_v17  ;;  %500 = vmatprep.subr.mxu0 %v2963_v18 }
  0x6f   :  { %501 = vmatpush1.msra.mxu0 %v2966_v19  ;;  %273 = vmatprep.mubr.f32.mxu0 %v3810_v0 }
  0x70   :  { %502 = vmatprep.subr.mxu0 %v2970_v20  ;;  %2229 = vmatprep.subr.mxu1 %v3810_v0 }
  0x71   :  { %503 = vmatpush1.msra.mxu0 %v2974_v21  ;;  %2215 = vmatmul.mubr.f32.gmra.mxu1 %v2915_v63 }
  0x72   :  { %274 = vmatmul.mubr.f32.gmra.mxu0 %v101_v23  ;;  %504 = vmatprep.subr.mxu0 %v2980_v24 }
  0x73   :  { %505 = vmatpush1.msra.mxu0 %v2983_v25  ;;  %540 = vmatprep.mubr.f32.mxu0 %v3810_v0 }
  0x74   :  { %506 = vmatprep.subr.mxu0 %v2987_v26  ;;  %2230 = vmatpush3.msra.mxu1 %v3010_v31 }
  0x75   :  { %507 = vmatpush1.msra.mxu0 %v2991_v27  ;;  %2217 = vmatprep.mubr.f32.mxu1 %v2931_v6 }
  0x76   :  { %541 = vmatmul.mubr.f32.vlgmr.msra.gmra.mxu0 %v3000_v29  ;;  %2231 = vmatprep.subr.mxu1 %v3810_v0 }
  0x77   :  { %418 = vperm.xlu0 %2550, %v416_v32   ;;  %2232 = vmatpush3.msra.mxu1 %v3018_v33 }
  0x78   :  { %648 = vmatprep.subr.mxu0 %v2871_v46  ;;  %2233 = vmatprep.subr.mxu1 %v3810_v0 }
  0x79   :  { %2218 = vmatmul.mubr.f32.gmra.mxu1 %v2947_v12  ;;  %649 = vmatpush1.msra.mxu0 %v2873_v47 }
  0x7a   :  { %2234 = vmatpush3.msra.mxu1 %v3024_v34  ;;  %2220 = vmatprep.mubr.f32.mxu1 %v100_v17 }
  0x7b   :  { %2235 = vmatprep.subr.mxu1 %v3810_v0  ;;  %650 = vmatprep.subr.mxu0 %v2875_v48 }
  0x7c   :  { %2236 = vmatpush3.msra.mxu1 %v3029_v35  ;;  %651 = vmatpush1.msra.mxu0 %v2879_v50 }
  0x7d   :  { %2237 = vmatprep.subr.mxu1 %v3810_v0  ;;  %2221 = vmatmul.mubr.f32.gmra.mxu1 %v101_v23 }
  0x7e   :  { %2238 = vmatpush3.msra.mxu1 %v3034_v36  ;;  %2255 = vmatprep.mubr.msk.f32.mxu1 %vm2798_vm0, %v3810_v0 }
  0x7f   :  { %2239 = vmatprep.subr.mxu1 %v3810_v0  ;;  %652 = vmatprep.subr.mxu0 %v2885_v52 }
  0x80   :  { %2240 = vmatpush3.msra.mxu1 %v3040_v37  ;;  %653 = vmatpush1.msra.mxu0 %v2888_v53 }
  0x81   :  { %2241 = vmatprep.subr.mxu1 %v3810_v0  ;;  %654 = vmatprep.subr.mxu0 %v2891_v54 }
  0x82   :  { %2242 = vmatpush3.msra.mxu1 %v3046_v38  ;;  %655 = vmatpush1.msra.mxu0 %v2895_v56 }
  0x83   :  { %2243 = vmatprep.subr.mxu1 %v3810_v0  ;;  %656 = vmatprep.subr.mxu0 %v2901_v58 }
  0x84   :  { %2244 = vmatpush3.msra.mxu1 %v3052_v39  ;;  %657 = vmatpush1.msra.mxu0 %v2904_v59 }
  0x85   :  { %2245 = vmatprep.subr.mxu1 %v3810_v0  ;;  %658 = vmatprep.subr.mxu0 %v2907_v60 }
  0x86   :  { %2246 = vmatpush3.msra.mxu1 %v3058_v40  ;;  %659 = vmatpush1.msra.mxu0 %v2911_v62 }
  0x87   :  { %2247 = vmatprep.subr.mxu1 %v3810_v0  ;;  %660 = vmatprep.subr.mxu0 %v2917_v1 }
  0x88   :  { %2248 = vmatpush3.msra.mxu1 %v3064_v41  ;;  %661 = vmatpush1.msra.mxu0 %v2920_v2 }
  0x89   :  { %2249 = vmatprep.subr.mxu1 %v3810_v0  ;;  %662 = vmatprep.subr.mxu0 %v2923_v3 }
  0x8a   :  { %2250 = vmatpush3.msra.mxu1 %v3070_v42  ;;  %663 = vmatpush1.msra.mxu0 %v2927_v5 }
  0x8b   :  { %2251 = vmatprep.subr.mxu1 %v3810_v0  ;;  %664 = vmatprep.subr.mxu0 %v2933_v7 }
  0x8c   :  { %2252 = vmatpush3.msra.mxu1 %v3076_v43  ;;  %665 = vmatpush1.msra.mxu0 %v2936_v8 }
  0x8d   :  { %2253 = vmatprep.subr.mxu1 %v3810_v0  ;;  %666 = vmatprep.subr.mxu0 %v2939_v9 }
  0x8e   :  { %2254 = vmatpush3.msra.mxu1 %v3082_v44  ;;  %667 = vmatpush1.msra.mxu0 %v2943_v11 }
  0x8f   :  { %2256 = vmatmul.mubr.f32.vlgmr.msra.gmra.mxu1 %v3000_v29  ;;  %2258 = vmatprep.subr.mxu1 %v3810_v0 }
  0x90   :  { %2259 = vmatpush3.msra.mxu1 %v2976_v22  ;;  %668 = vmatprep.subr.mxu0 %v2949_v13 }
  0x91   :  { %2260 = vmatprep.subr.mxu1 %v3810_v0  ;;  %669 = vmatpush1.msra.mxu0 %v2952_v14 }
  0x92   :  { %2261 = vmatpush3.msra.mxu1 %v2993_v28  ;;  %670 = vmatprep.subr.mxu0 %v2955_v15 }
  0x93   :  { %2262 = vmatprep.subr.mxu1 %v3810_v0  ;;  %671 = vmatpush1.msra.mxu0 %v2959_v16 }
  0x94   :  { %2263 = vmatpush3.msra.mxu1 %v3004_v30  ;;  %672 = vmatprep.subr.mxu0 %v2963_v18 }
  0x95   :  { %2264 = vmatprep.subr.mxu1 %v3810_v0  ;;  %673 = vmatpush1.msra.mxu0 %v2966_v19 }
  0x96   :  { %2265 = vmatpush3.msra.mxu1 %v3010_v31  ;;  %674 = vmatprep.subr.mxu0 %v2970_v20 }
  0x97   :  { %2266 = vmatprep.subr.mxu1 %v3810_v0  ;;  %675 = vmatpush1.msra.mxu0 %v2974_v21 }
  0x98   :  { %2267 = vmatpush3.msra.mxu1 %v3018_v33  ;;  %676 = vmatprep.subr.mxu0 %v2980_v24 }
  0x99   :  { %2268 = vmatprep.subr.mxu1 %v3810_v0  ;;  %677 = vmatpush1.msra.mxu0 %v2983_v25 }
  0x9a   :  { %2269 = vmatpush3.msra.mxu1 %v3024_v34  ;;  %678 = vmatprep.subr.mxu0 %v2987_v26 }
  0x9b   :  { %2270 = vmatprep.subr.mxu1 %v3810_v0  ;;  %679 = vmatpush1.msra.mxu0 %v2991_v27 }
  0x9c   :  { %2271 = vmatpush3.msra.mxu1 %v3029_v35  ;;  %712 = vmatprep.mubr.f32.mxu0 %v3810_v0 }
  0x9d   :  { %2272 = vmatprep.subr.mxu1 %v3810_v0  ;;  %2290 = vmatprep.mubr.msk.f32.mxu1 %vm2798_vm0, %v3810_v0 }
  0x9e   :  { %2273 = vmatpush3.msra.mxu1 %v3034_v36  ;;  %821 = vmatprep.subr.mxu0 %v2871_v46 }
  0x9f   :  { %2274 = vmatprep.subr.mxu1 %v3810_v0 }
  0xa0   :  { %2275 = vmatpush3.msra.mxu1 %v3040_v37 }
  0xa1   :  { %2276 = vmatprep.subr.mxu1 %v3810_v0 }
  0xa2   :  { %2277 = vmatpush3.msra.mxu1 %v3046_v38 }
  0xa3   :  { %2278 = vmatprep.subr.mxu1 %v3810_v0 }
  0xa4   :  { %2279 = vmatpush3.msra.mxu1 %v3052_v39 }
  0xa5   :  { %2280 = vmatprep.subr.mxu1 %v3810_v0 }
  0xa6   :  { %2281 = vmatpush3.msra.mxu1 %v3058_v40 }
  0xa7   :  { %2282 = vmatprep.subr.mxu1 %v3810_v0 }
  0xa8   :  { %2283 = vmatpush3.msra.mxu1 %v3064_v41 }
  0xa9   :  { %2284 = vmatprep.subr.mxu1 %v3810_v0 }
  0xaa   :  { %2285 = vmatpush3.msra.mxu1 %v3070_v42 }
  0xab   :  { %2286 = vmatprep.subr.mxu1 %v3810_v0 }
  0xac   :  { %2287 = vmatpush3.msra.mxu1 %v3076_v43 }
  0xad   :  { %2288 = vmatprep.subr.mxu1 %v3810_v0 }
  0xae   :  { %2289 = vmatpush3.msra.mxu1 %v3082_v44 }
  0xaf   :  { %2293 = vmatprep.subr.mxu1 %v3810_v0 }
 0x116   :  { %v233_v57 = vpop.f32.mrf.mxu0 }
 0x118   :  { %v235_v63 = vpop.f32.mrf.mxu0 }
 0x11a   :  { %v239_v6 = vpop.f32.mrf.mxu0 }
 0x11b   :  { %v3145_v12 = vadd.f32 %v239_v6, %v155_v4 }
 0x11c   :  { %v241_v17 = vpop.f32.mrf.mxu0 }
 0x11d   :  { %3838 = vst [vmem:[#allocation24_spill] sm:$0xff] %v3145_v12  ;;  %v3147_v23 = vadd.f32 %v241_v17, %v159_v10  ;;  %v162_v17 = vsub.s32 2, %v153_v49 }
 0x11e   :  { %v245_v32 = vpop.f32.mrf.mxu0 }
 0x11f   :  { %3839 = vst [vmem:[#allocation25_spill] sm:$0xff] %v3147_v23  ;;  %v3149_v0 = vadd.f32 %v245_v32, %v155_v4 }
 0x120   :  { %v247_v45 = vpop.f32.mrf.mxu0 }
 0x121   :  { %3840 = vst [vmem:[#allocation26_spill] sm:$0xff] %v3149_v0  ;;  %v3151_v46 = vadd.f32 %v247_v45, %v159_v10  ;;  %v163_v45 = vrot.slane %v150_v55, %v162_v17 }
 0x122   :  { %v251_v44 = vpop.f32.mrf.mxu0 }
 0x123   :  { %3841 = vst [vmem:[#allocation27_spill] sm:$0xff] %v3151_v46  ;;  %v3153_v27 = vadd.f32 %v251_v44, %v155_v4 }
 0x124   :  { %v253_v26 = vpop.f32.mrf.mxu0 }
 0x125   :  { %3842 = vst [vmem:[#allocation28_spill] sm:$0xff] %v3153_v27  ;;  %v3155_v43 = vadd.f32 %v253_v26, %v159_v10  ;;  %v2213_v26 = vpop.f32.mrf.mxu1 }
 0x126   :  { %v257_v51 = vpop.f32.mrf.mxu0 }
 0x127   :  { %3843 = vst [vmem:[#allocation29_spill] sm:$0xff] %v3155_v43  ;;  %v3157_v25 = vadd.f32 %v257_v51, %v155_v4  ;;  %v3169_v51 = vadd.f32 %v2213_v26, %v163_v45 }
 0x128   :  { %v259_v61 = vpop.f32.mrf.mxu0 }
 0x129   :  { %3844 = vst [vmem:[#allocation30_spill] sm:$0xff] %v3157_v25  ;;  %v3159_v6 = vadd.f32 %v259_v61, %v159_v10 }
 0x12a   :  { %v263_v23 = vpop.f32.mrf.mxu0 }
 0x12b   :  { %3845 = vst [vmem:[#allocation31_spill] sm:$0xff] %v3159_v6  ;;  %v3161_v12 = vadd.f32 %v263_v23, %v155_v4  ;;  %v234_v6 = vadd.f32 %v233_v57, %v155_v4 }
 0x12c   :  { %v265_v32 = vpop.f32.mrf.mxu0 }
 0x12d   :  { %3846 = vst [vmem:[#allocation32_spill] sm:$0xff] %v3161_v12  ;;  %v3163_v0 = vadd.f32 %v265_v32, %v159_v10  ;;  %v346_v32 = vpop.f32.mrf.mxu1 }
 0x12e   :  { %v269_v46 = vpop.f32.mrf.mxu0 }
 0x12f   :  { %3847 = vst [vmem:[#allocation33_spill] sm:$0xff] %v3163_v0  ;;  %v3165_v44 = vadd.f32 %v269_v46, %v155_v4 }
 0x130   :  { %v271_v27 = vpop.f32.mrf.mxu0 }
 0x131   :  { %3848 = vst [vmem:[#allocation34_spill] sm:$0xff] %v3165_v44  ;;  %v3167_v43 = vadd.f32 %v271_v27, %v159_v10  ;;  %v2216_v55 = vpop.f32.mrf.mxu1  ;;  %v236_v27 = vadd.f32 %v235_v63, %v159_v10 }
 0x132   :  { %v275_v25 = vpop.f32.mrf.mxu0  ;;  %v3175_v46 = vadd.f32 %v2216_v55, %v163_v45 }
 0x133   :  { %3849 = vst [vmem:[#allocation35_spill] sm:$0xff] %v3167_v43  ;;  %v3171_v61 = vadd.f32 %v275_v25, %v155_v4  ;;  %v356_v24 = vpop.f32.mrf.mxu1 }
 0x134   :  { %v277_v49 = vpop.f32.mrf.mxu0  ;;  %3852 = vst [vmem:[#allocation38_spill] sm:$0xff] %v3175_v46  ;;  %v3177_v26 = vadd.f32 %v356_v24, %v163_v45 }
 0x135   :  { %3850 = vst [vmem:[#allocation36_spill] sm:$0xff] %v3171_v61  ;;  %v3173_v23 = vadd.f32 %v277_v49, %v159_v10 }
 0x136   :  { %v542_v12 = vpop.f32.mrf.mxu0  ;;  %3853 = vst [vmem:[#allocation39_spill] sm:$0xff] %v3177_v26 }
 0x137   :  { %3851 = vst [vmem:[#allocation37_spill] sm:$0xff] %v3173_v23  ;;  %v617_v0 = vadd.f32 %v542_v12, %v234_v6 }
 0x138   :  { %v544_v44 = vpop.f32.mrf.mxu0 }
 0x139   :  { %v1977_v17 = vmul.f32 -1.442695, %v617_v0  ;;  %v2219_v43 = vpop.f32.mrf.mxu1  ;;  %v624_v25 = vadd.f32 %v544_v44, %v236_v27 }
 0x13a   :  { %v3179_v61 = vadd.f32 %v2219_v43, %v163_v45  ;;  %v3190_v43 = vld [vmem:[%s3806_s6] ss:$0 sm:$0xff] }
 0x13b   :  { %2551 = vpow2.f32 %v1977_v17  ;;  %v366_v57 = vpop.f32.mrf.mxu1  ;;  %v1978_v23 = vmul.f32 -1.442695, %v624_v25 }
 0x13c   :  { %3854 = vst [vmem:[#allocation40_spill] sm:$0xff] %v3179_v61  ;;  %v3181_v4 = vadd.f32 %v366_v57, %v163_v45  ;;  %v347_v57 = vadd.f32 %v346_v32, %v163_v45  ;;  %v3861_v32 = vld [vmem:[#allocation22_spill] sm:$0xff] }
 0x13d   :  { %v2222_v49 = vpop.f32.mrf.mxu1  ;;  %2553 = vpow2.f32 %v1978_v23 }
 0x13e   :  { %3855 = vst [vmem:[#allocation41_spill] sm:$0xff] %v3181_v4  ;;  %v3183_v12 = vadd.f32 %v2222_v49, %v163_v45 }
 0x13f   :  { %v376_v0 = vpop.f32.mrf.mxu1 }
 0x140   :  { %3856 = vst [vmem:[#allocation42_spill] sm:$0xff] %v3183_v12  ;;  %v3185_v6 = vadd.f32 %v376_v0, %v163_v45  ;;  %v3858_v45 = vmov 0.0  }
 0x142   :  { %3857 = vst [vmem:[#allocation43_spill] sm:$0xff] %v3185_v6 }
 0x148   :  { %v2552_v55 = vpop.eup %2551 }
 0x149   :  { %v621_v63 = vadd.f32 1.0, %v2552_v55  ;;  %v3193_v55 = vpop.permute.xlu0 %418 }
 0x14a   :  { %v2554_v24 = vpop.eup %2553  ;;  %vm1979_vm1 = vcmp.gt.s32.totalorder %v3193_v55, 0  ;;  %vm1982_vm2 = vcmp.gt.s32.totalorder %v3193_v55, 1  ;;  %vm1985_vm3 = vcmp.gt.s32.totalorder %v3193_v55, 2  ;;  %vm1988_vm4 = vcmp.gt.s32.totalorder %v3193_v55, 3 }
 0x14b   :  { %2555 = vrcp.f32 %v621_v63  ;;  %v628_v17 = vadd.f32 1.0, %v2554_v24  ;;  %vm1991_vm5 = vcmp.gt.s32.totalorder %v3193_v55, 4  ;;  %vm1994_vm6 = vcmp.gt.s32.totalorder %v3193_v55, 5 }
 0x14c   :  { %vm1997_vm7 = vcmp.gt.s32.totalorder %v3193_v55, 6  ;;  %vm2000_vm8 = vcmp.gt.s32.totalorder %v3193_v55, 7 }
 0x14d   :  { %2557 = vrcp.f32 %v628_v17  ;;  %v3865_v17 = vld [vmem:[#allocation17_spill] sm:$0xff] }
 0x14f   :  { %v613_v10 = vpop.f32.mrf.mxu1 }
 0x150   :  { %v631_v27 = vadd.f32 %v3190_v43, %v613_v10  ;;  %v3864_v10 = vld [vmem:[#allocation23_spill] sm:$0xff] }
 0x151   :  { %v2257_v44 = vpop.f32.mrf.mxu1 }
 0x158   :  { %v2556_v25 = vpop.eup %2555 }
 0x159   :  { %v632_v49 = vmul.f32 %v2556_v25, %v631_v27 }
 0x15a   :  { %v2558_v23 = vpop.eup %2557 }
 0x15b   :  { %v633_v0 = vadd.f32 %v632_v49, %v347_v57  ;;  %v635_v63 = vsub.f32 1.0, %v2558_v23  ;;  %v637_v61 = vmul.f32 %v2558_v23, %v3000_v29  ;;  %v3866_v57 = vld [vmem:[#allocation24_spill] sm:$0xff] }
 0x15d   :  { %2559 = vtanh.f32 %v633_v0 }
 0x16a   :  { %v2560_v12 = vpop.eup %2559 }
 0x16b   :  { %v636_v6 = vmul.f32 %v2560_v12, %v635_v63  ;;  %v3862_v12 = vld [vmem:[#allocation20_spill] sm:$0xff] }
 0x16d   :  { %v638_v44 = vadd.f32 %v637_v61, %v636_v6  ;;  %v3860_v61 = vld [vmem:[#allocation19_spill] sm:$0xff]  ;;  %v3863_v6 = vld [vmem:[#allocation21_spill] sm:$0xff] }
 0x16f   :  { %v3198_v24 = vsel %vm1979_vm1, %v638_v44, %v3000_v29  ;;  %v3859_v29 = vld [vmem:[#allocation18_spill] sm:$0xff]  ;;  %v3867_v44 = vld [vmem:[#allocation25_spill] sm:$0xff] }
 0x170   :  { %713 = vmatmul.mubr.f32.vlgmr.msra.gmra.mxu0 %v3198_v24  ;;  %2291 = vmatmul.mubr.f32.vlgmr.msra.gmra.mxu1 %v3198_v24 }
 0x171   :  { %822 = vmatpush1.msra.mxu0 %v2873_v47  ;;  %2294 = vmatpush3.msra.mxu1 %v2976_v22 }
 0x172   :  { %823 = vmatprep.subr.mxu0 %v2875_v48  ;;  %2295 = vmatprep.subr.mxu1 %v3858_v45 }
 0x173   :  { %824 = vmatpush1.msra.mxu0 %v2879_v50  ;;  %2296 = vmatpush3.msra.mxu1 %v2993_v28 }
 0x174   :  { %825 = vmatprep.subr.mxu0 %v2885_v52  ;;  %2297 = vmatprep.subr.mxu1 %v3858_v45 }
 0x175   :  { %826 = vmatpush1.msra.mxu0 %v2888_v53  ;;  %2298 = vmatpush3.msra.mxu1 %v3004_v30 }
 0x176   :  { %827 = vmatprep.subr.mxu0 %v2891_v54  ;;  %2299 = vmatprep.subr.mxu1 %v3858_v45 }
 0x177   :  { %828 = vmatpush1.msra.mxu0 %v2895_v56  ;;  %2300 = vmatpush3.msra.mxu1 %v3010_v31 }
 0x178   :  { %829 = vmatprep.subr.mxu0 %v2901_v58  ;;  %2301 = vmatprep.subr.mxu1 %v3858_v45 }
 0x179   :  { %830 = vmatpush1.msra.mxu0 %v2904_v59  ;;  %2302 = vmatpush3.msra.mxu1 %v3018_v33 }
 0x17a   :  { %831 = vmatprep.subr.mxu0 %v2907_v60  ;;  %2303 = vmatprep.subr.mxu1 %v3858_v45 }
 0x17b   :  { %832 = vmatpush1.msra.mxu0 %v2911_v62  ;;  %2304 = vmatpush3.msra.mxu1 %v3024_v34 }
 0x17c   :  { %833 = vmatprep.subr.mxu0 %v2917_v1  ;;  %2305 = vmatprep.subr.mxu1 %v3858_v45 }
 0x17d   :  { %834 = vmatpush1.msra.mxu0 %v2920_v2  ;;  %2306 = vmatpush3.msra.mxu1 %v3029_v35 }
 0x17e   :  { %835 = vmatprep.subr.mxu0 %v2923_v3  ;;  %2307 = vmatprep.subr.mxu1 %v3858_v45 }
 0x17f   :  { %836 = vmatpush1.msra.mxu0 %v2927_v5  ;;  %2308 = vmatpush3.msra.mxu1 %v3034_v36 }
 0x180   :  { %837 = vmatprep.subr.mxu0 %v2933_v7  ;;  %2309 = vmatprep.subr.mxu1 %v3858_v45 }
 0x181   :  { %838 = vmatpush1.msra.mxu0 %v2936_v8  ;;  %2310 = vmatpush3.msra.mxu1 %v3040_v37 }
 0x182   :  { %839 = vmatprep.subr.mxu0 %v2939_v9  ;;  %2311 = vmatprep.subr.mxu1 %v3858_v45 }
 0x183   :  { %840 = vmatpush1.msra.mxu0 %v2943_v11  ;;  %2312 = vmatpush3.msra.mxu1 %v3046_v38 }
 0x184   :  { %841 = vmatprep.subr.mxu0 %v2949_v13  ;;  %2313 = vmatprep.subr.mxu1 %v3858_v45 }
 0x185   :  { %842 = vmatpush1.msra.mxu0 %v2952_v14  ;;  %2314 = vmatpush3.msra.mxu1 %v3052_v39 }
 0x186   :  { %843 = vmatprep.subr.mxu0 %v2955_v15  ;;  %2315 = vmatprep.subr.mxu1 %v3858_v45 }
 0x187   :  { %844 = vmatpush1.msra.mxu0 %v2959_v16  ;;  %2316 = vmatpush3.msra.mxu1 %v3058_v40 }
 0x188   :  { %845 = vmatprep.subr.mxu0 %v2963_v18  ;;  %2317 = vmatprep.subr.mxu1 %v3858_v45 }
 0x189   :  { %846 = vmatpush1.msra.mxu0 %v2966_v19  ;;  %2318 = vmatpush3.msra.mxu1 %v3064_v41 }
 0x18a   :  { %847 = vmatprep.subr.mxu0 %v2970_v20  ;;  %2319 = vmatprep.subr.mxu1 %v3858_v45 }
 0x18b   :  { %848 = vmatpush1.msra.mxu0 %v2974_v21  ;;  %2320 = vmatpush3.msra.mxu1 %v3070_v42 }
 0x18c   :  { %849 = vmatprep.subr.mxu0 %v3859_v29  ;;  %2321 = vmatprep.subr.mxu1 %v3858_v45 }
 0x18d   :  { %850 = vmatpush1.msra.mxu0 %v3860_v61  ;;  %2322 = vmatpush3.msra.mxu1 %v3861_v32 }
 0x18e   :  { %851 = vmatprep.subr.mxu0 %v3862_v12  ;;  %2323 = vmatprep.subr.mxu1 %v3858_v45 }
 0x18f   :  { %852 = vmatpush1.msra.mxu0 %v3863_v6  ;;  %885 = vmatprep.mubr.f32.mxu0 %v3858_v45 }
 0x190   :  { %2324 = vmatpush3.msra.mxu1 %v3864_v10  ;;  %2325 = vmatprep.mubr.msk.f32.mxu1 %vm2798_vm0, %v3858_v45 }
 0x191   :  { %994 = vmatprep.subr.mxu0 %v3865_v17  ;;  %2328 = vmatprep.subr.mxu1 %v3858_v45 }
 0x230   :  { %v714_v27 = vpop.f32.mrf.mxu0  ;;  %v785_v25 = vpop.f32.mrf.mxu1 }
 0x231   :  { %v789_v49 = vadd.f32 %v714_v27, %v3866_v57  ;;  %v803_v17 = vadd.f32 %v3190_v43, %v785_v25 }
 0x232   :  { %v2292_v0 = vpop.f32.mrf.mxu1  ;;  %v716_v63 = vpop.f32.mrf.mxu0 }
 0x233   :  { %v1980_v23 = vmul.f32 -1.442695, %v789_v49  ;;  %v796_v4 = vadd.f32 %v716_v63, %v3867_v44 }
 0x235   :  { %2561 = vpow2.f32 %v1980_v23  ;;  %v1981_v46 = vmul.f32 -1.442695, %v796_v4 }
 0x237   :  { %2563 = vpow2.f32 %v1981_v46 }
 0x242   :  { %v2562_v26 = vpop.eup %2561 }
 0x243   :  { %v793_v10 = vadd.f32 1.0, %v2562_v26 }
 0x244   :  { %v2564_v6 = vpop.eup %2563 }
 0x245   :  { %2565 = vrcp.f32 %v793_v10  ;;  %v800_v12 = vadd.f32 1.0, %v2564_v6 }
 0x247   :  { %2567 = vrcp.f32 %v800_v12 }
 0x252   :  { %v2566_v32 = vpop.eup %2565 }
 0x253   :  { %v804_v61 = vmul.f32 %v2566_v32, %v803_v17  ;;  %v3875_v17 = vld [vmem:[#allocation27_spill] sm:$0xff] }
 0x254   :  { %v2568_v57 = vpop.eup %2567 }
 0x255   :  { %v805_v27 = vadd.f32 %v804_v61, %v3169_v51  ;;  %v807_v49 = vsub.f32 1.0, %v2568_v57  ;;  %v809_v4 = vmul.f32 %v2568_v57, %v3198_v24  ;;  %v3874_v61 = vld [vmem:[#allocation26_spill] sm:$0xff] }
 0x257   :  { %2569 = vtanh.f32 %v805_v27 }
 0x264   :  { %v2570_v0 = vpop.eup %2569 }
 0x265   :  { %v808_v23 = vmul.f32 %v2570_v0, %v807_v49 }
 0x267   :  { %v810_v46 = vadd.f32 %v809_v4, %v808_v23 }
 0x269   :  { %v3276_v26 = vsel %vm1982_vm2, %v810_v46, %v3198_v24  ;;  %v3876_v46 = vld [vmem:[#allocation39_spill] sm:$0xff] }
 0x26a   :  { %886 = vmatmul.mubr.f32.vlgmr.msra.gmra.mxu0 %v3276_v26  ;;  %2326 = vmatmul.mubr.f32.vlgmr.msra.gmra.mxu1 %v3276_v26 }
 0x26b   :  { %995 = vmatpush1.msra.mxu0 %v2873_v47  ;;  %2329 = vmatpush3.msra.mxu1 %v2976_v22  ;;  %v3868_v47 = vld [vmem:[#allocation19_spill] sm:$0xff] }
 0x26c   :  { %996 = vmatprep.subr.mxu0 %v2875_v48  ;;  %2330 = vmatprep.subr.mxu1 %v3858_v45  ;;  %v3869_v48 = vld [vmem:[#allocation22_spill] sm:$0xff] }
 0x26d   :  { %997 = vmatpush1.msra.mxu0 %v2879_v50  ;;  %2331 = vmatpush3.msra.mxu1 %v2993_v28  ;;  %v3870_v50 = vld [vmem:[#allocation20_spill] sm:$0xff] }
 0x26e   :  { %998 = vmatprep.subr.mxu0 %v2885_v52  ;;  %2332 = vmatprep.subr.mxu1 %v3858_v45  ;;  %v3871_v52 = vld [vmem:[#allocation21_spill] sm:$0xff] }
 0x26f   :  { %999 = vmatpush1.msra.mxu0 %v2888_v53  ;;  %2333 = vmatpush3.msra.mxu1 %v3004_v30  ;;  %v3872_v53 = vld [vmem:[#allocation23_spill] sm:$0xff] }
 0x270   :  { %1000 = vmatprep.subr.mxu0 %v2891_v54  ;;  %2334 = vmatprep.subr.mxu1 %v3858_v45  ;;  %v3873_v54 = vld [vmem:[#allocation17_spill] sm:$0xff] }
 0x271   :  { %1001 = vmatpush1.msra.mxu0 %v2895_v56  ;;  %2335 = vmatpush3.msra.mxu1 %v3010_v31 }
 0x272   :  { %1002 = vmatprep.subr.mxu0 %v2901_v58  ;;  %2336 = vmatprep.subr.mxu1 %v3858_v45 }
 0x273   :  { %1003 = vmatpush1.msra.mxu0 %v2904_v59  ;;  %2337 = vmatpush3.msra.mxu1 %v3018_v33 }
 0x274   :  { %1004 = vmatprep.subr.mxu0 %v2907_v60  ;;  %2338 = vmatprep.subr.mxu1 %v3858_v45 }
 0x275   :  { %1005 = vmatpush1.msra.mxu0 %v2911_v62  ;;  %2339 = vmatpush3.msra.mxu1 %v3024_v34 }
 0x276   :  { %1006 = vmatprep.subr.mxu0 %v2917_v1  ;;  %2340 = vmatprep.subr.mxu1 %v3858_v45 }
 0x277   :  { %1007 = vmatpush1.msra.mxu0 %v2920_v2  ;;  %2341 = vmatpush3.msra.mxu1 %v3029_v35 }
 0x278   :  { %1008 = vmatprep.subr.mxu0 %v2923_v3  ;;  %2342 = vmatprep.subr.mxu1 %v3858_v45 }
 0x279   :  { %1009 = vmatpush1.msra.mxu0 %v2927_v5  ;;  %2343 = vmatpush3.msra.mxu1 %v3034_v36 }
 0x27a   :  { %1010 = vmatprep.subr.mxu0 %v2933_v7  ;;  %2344 = vmatprep.subr.mxu1 %v3858_v45 }
 0x27b   :  { %1011 = vmatpush1.msra.mxu0 %v2936_v8  ;;  %2345 = vmatpush3.msra.mxu1 %v3040_v37 }
 0x27c   :  { %1012 = vmatprep.subr.mxu0 %v2939_v9  ;;  %2346 = vmatprep.subr.mxu1 %v3858_v45 }
 0x27d   :  { %1013 = vmatpush1.msra.mxu0 %v2943_v11  ;;  %2347 = vmatpush3.msra.mxu1 %v3046_v38 }
 0x27e   :  { %1014 = vmatprep.subr.mxu0 %v2949_v13  ;;  %2348 = vmatprep.subr.mxu1 %v3858_v45 }
 0x27f   :  { %1015 = vmatpush1.msra.mxu0 %v2952_v14  ;;  %2349 = vmatpush3.msra.mxu1 %v3052_v39 }
 0x280   :  { %1016 = vmatprep.subr.mxu0 %v2955_v15  ;;  %2350 = vmatprep.subr.mxu1 %v3858_v45 }
 0x281   :  { %1017 = vmatpush1.msra.mxu0 %v2959_v16  ;;  %2351 = vmatpush3.msra.mxu1 %v3058_v40 }
 0x282   :  { %1018 = vmatprep.subr.mxu0 %v2963_v18  ;;  %2352 = vmatprep.subr.mxu1 %v3858_v45 }
 0x283   :  { %1019 = vmatpush1.msra.mxu0 %v2966_v19  ;;  %2353 = vmatpush3.msra.mxu1 %v3064_v41 }
 0x284   :  { %1020 = vmatprep.subr.mxu0 %v2970_v20  ;;  %2354 = vmatprep.subr.mxu1 %v3858_v45 }
 0x285   :  { %1021 = vmatpush1.msra.mxu0 %v2974_v21  ;;  %2355 = vmatpush3.msra.mxu1 %v3070_v42 }
 0x286   :  { %1022 = vmatprep.subr.mxu0 %v3859_v29  ;;  %2356 = vmatprep.subr.mxu1 %v3858_v45 }
 0x287   :  { %1023 = vmatpush1.msra.mxu0 %v3868_v47  ;;  %2357 = vmatpush3.msra.mxu1 %v3869_v48 }
 0x288   :  { %1024 = vmatprep.subr.mxu0 %v3870_v50  ;;  %2358 = vmatprep.subr.mxu1 %v3858_v45 }
 0x289   :  { %1025 = vmatpush1.msra.mxu0 %v3871_v52  ;;  %1058 = vmatprep.mubr.f32.mxu0 %v3858_v45 }
 0x28a   :  { %2359 = vmatpush3.msra.mxu1 %v3872_v53  ;;  %2360 = vmatprep.mubr.msk.f32.mxu1 %vm2798_vm0, %v3858_v45 }
 0x28b   :  { %1167 = vmatprep.subr.mxu0 %v3873_v54  ;;  %2363 = vmatprep.subr.mxu1 %v3858_v45 }
 0x32a   :  { %v887_v51 = vpop.f32.mrf.mxu0  ;;  %v958_v24 = vpop.f32.mrf.mxu1 }
 0x32b   :  { %v962_v32 = vadd.f32 %v887_v51, %v3874_v61  ;;  %v976_v0 = vadd.f32 %v3190_v43, %v958_v24  ;;  %v3358_v24 = vld [vmem:[#allocation9 + $0x168] sm:$0xff] }
 0x32c   :  { %v2327_v12 = vpop.f32.mrf.mxu1  ;;  %v889_v10 = vpop.f32.mrf.mxu0 }
 0x32d   :  { %v1983_v6 = vmul.f32 -1.442695, %v962_v32  ;;  %v969_v25 = vadd.f32 %v889_v10, %v3875_v17 }
 0x32f   :  { %2571 = vpow2.f32 %v1983_v6  ;;  %v1984_v63 = vmul.f32 -1.442695, %v969_v25  ;;  %v3362_v25 = vld [vmem:[#allocation9 + $0x158] sm:$0xff] }
 0x331   :  { %2573 = vpow2.f32 %v1984_v63  ;;  %v3366_v63 = vld [vmem:[#allocation9 + $0x150] sm:$0xff] }
 0x33c   :  { %v2572_v44 = vpop.eup %2571 }
 0x33d   :  { %v966_v27 = vadd.f32 1.0, %v2572_v44  ;;  %v3374_v44 = vld [vmem:[#allocation9 + $0x138] sm:$0xff] }
 0x33e   :  { %v2574_v57 = vpop.eup %2573 }
 0x33f   :  { %2575 = vrcp.f32 %v966_v27  ;;  %v973_v49 = vadd.f32 1.0, %v2574_v57  ;;  %v3463_v27 = vld [vmem:[#allocation9 + $0x148] sm:$0xff]  ;;  %v3468_v57 = vld [vmem:[#allocation9 + $0x120] sm:$0xff] }
 0x341   :  { %2577 = vrcp.f32 %v973_v49  ;;  %v3471_v49 = vld [vmem:[#allocation9 + $0x130] sm:$0xff] }
 0x34c   :  { %v2576_v23 = vpop.eup %2575 }
 0x34d   :  { %v977_v4 = vmul.f32 %v2576_v23, %v976_v0  ;;  %v3474_v0 = vld [vmem:[#allocation9 + $0x110] sm:$0xff]  ;;  %v3478_v23 = vld [vmem:[#allocation9 + $0x108] sm:$0xff] }
 0x34e   :  { %v2578_v51 = vpop.eup %2577 }
 0x34f   :  { %v978_v54 = vadd.f32 %v977_v4, %v3876_v46  ;;  %v980_v61 = vsub.f32 1.0, %v2578_v51  ;;  %v982_v6 = vmul.f32 %v2578_v51, %v3276_v26  ;;  %v3481_v4 = vld [vmem:[#allocation9 + $0x118] sm:$0xff]  ;;  %v3492_v51 = vld [vmem:[#allocation9 + $0xe0] sm:$0xff] }
 0x350   :  { %v3484_v46 = vld [vmem:[#allocation9 + $0xf8] sm:$0xff] }
 0x351   :  { %2579 = vtanh.f32 %v978_v54  ;;  %v3488_v54 = vld [vmem:[#allocation9 + $0xf0] sm:$0xff] }
 0x35e   :  { %v2580_v32 = vpop.eup %2579 }
 0x35f   :  { %v981_v12 = vmul.f32 %v2580_v32, %v980_v61  ;;  %v3496_v61 = vld [vmem:[#allocation9 + $0xd8] sm:$0xff]  ;;  %v3500_v32 = vld [vmem:[#allocation9 + $0xc8] sm:$0xff] }
 0x361   :  { %v983_v10 = vadd.f32 %v982_v6, %v981_v12  ;;  %v3504_v12 = vld [vmem:[#allocation9 + $0xc0] sm:$0xff]  ;;  %v3512_v6 = vld [vmem:[#allocation9 + $0xa8] sm:$0xff] }
 0x363   :  { %v3354_v17 = vsel %vm1985_vm3, %v983_v10, %v3276_v26  ;;  %v3370_v26 = vld [vmem:[#allocation9 + $0x140] sm:$0xff]  ;;  %v3520_v10 = vld [vmem:[#allocation9 + $0x90] sm:$0xff] }
 0x364   :  { %1059 = vmatmul.mubr.f32.vlgmr.msra.gmra.mxu0 %v3354_v17  ;;  %2361 = vmatmul.mubr.f32.vlgmr.msra.gmra.mxu1 %v3354_v17 }
 0x365   :  { %1168 = vmatpush1.msra.mxu0 %v3358_v24  ;;  %2364 = vmatpush3.msra.mxu1 %v2976_v22  ;;  %v3378_v22 = vld [vmem:[#allocation9 + $0x128] sm:$0xff] }
 0x366   :  { %1169 = vmatprep.subr.mxu0 %v3362_v25  ;;  %2365 = vmatprep.subr.mxu1 %v3858_v45 }
 0x367   :  { %1170 = vmatpush1.msra.mxu0 %v3366_v63  ;;  %2366 = vmatpush3.msra.mxu1 %v2993_v28 }
 0x368   :  { %1171 = vmatprep.subr.mxu0 %v3370_v26  ;;  %2367 = vmatprep.subr.mxu1 %v3858_v45 }
 0x369   :  { %1172 = vmatpush1.msra.mxu0 %v3374_v44  ;;  %2368 = vmatpush3.msra.mxu1 %v3004_v30 }
 0x36a   :  { %1173 = vmatprep.subr.mxu0 %v3378_v22  ;;  %2369 = vmatprep.subr.mxu1 %v3858_v45 }
 0x36b   :  { %1174 = vmatpush1.msra.mxu0 %v2895_v56  ;;  %2370 = vmatpush3.msra.mxu1 %v3010_v31  ;;  %v3435_v56 = vld [vmem:[#allocation9 + $0x170] sm:$0xff] }
 0x36c   :  { %1175 = vmatprep.subr.mxu0 %v2901_v58  ;;  %2371 = vmatprep.subr.mxu1 %v3858_v45 }
 0x36d   :  { %1176 = vmatpush1.msra.mxu0 %v2904_v59  ;;  %2372 = vmatpush3.msra.mxu1 %v3018_v33 }
 0x36e   :  { %1177 = vmatprep.subr.mxu0 %v2907_v60  ;;  %2373 = vmatprep.subr.mxu1 %v3858_v45  ;;  %v3877_v60 = vld [vmem:[#allocation28_spill] sm:$0xff] }
 0x36f   :  { %1178 = vmatpush1.msra.mxu0 %v2911_v62  ;;  %2374 = vmatpush3.msra.mxu1 %v3024_v34 }
 0x370   :  { %1179 = vmatprep.subr.mxu0 %v2917_v1  ;;  %2375 = vmatprep.subr.mxu1 %v3858_v45 }
 0x371   :  { %1180 = vmatpush1.msra.mxu0 %v2920_v2  ;;  %2376 = vmatpush3.msra.mxu1 %v3029_v35 }
 0x372   :  { %1181 = vmatprep.subr.mxu0 %v2923_v3  ;;  %2377 = vmatprep.subr.mxu1 %v3858_v45 }
 0x373   :  { %1182 = vmatpush1.msra.mxu0 %v2927_v5  ;;  %2378 = vmatpush3.msra.mxu1 %v3034_v36  ;;  %v3878_v5 = vld [vmem:[#allocation29_spill] sm:$0xff] }
 0x374   :  { %1183 = vmatprep.subr.mxu0 %v2933_v7  ;;  %2379 = vmatprep.subr.mxu1 %v3858_v45 }
 0x375   :  { %1184 = vmatpush1.msra.mxu0 %v2936_v8  ;;  %2380 = vmatpush3.msra.mxu1 %v3040_v37 }
 0x376   :  { %1185 = vmatprep.subr.mxu0 %v2939_v9  ;;  %2381 = vmatprep.subr.mxu1 %v3858_v45 }
 0x377   :  { %1186 = vmatpush1.msra.mxu0 %v2943_v11  ;;  %2382 = vmatpush3.msra.mxu1 %v3046_v38 }
 0x378   :  { %1187 = vmatprep.subr.mxu0 %v2949_v13  ;;  %2383 = vmatprep.subr.mxu1 %v3858_v45 }
 0x379   :  { %1188 = vmatpush1.msra.mxu0 %v2952_v14  ;;  %2384 = vmatpush3.msra.mxu1 %v3052_v39 }
 0x37a   :  { %1189 = vmatprep.subr.mxu0 %v2955_v15  ;;  %2385 = vmatprep.subr.mxu1 %v3858_v45 }
 0x37b   :  { %1190 = vmatpush1.msra.mxu0 %v2959_v16  ;;  %2386 = vmatpush3.msra.mxu1 %v3058_v40 }
 0x37c   :  { %1191 = vmatprep.subr.mxu0 %v2963_v18  ;;  %2387 = vmatprep.subr.mxu1 %v3858_v45 }
 0x37d   :  { %1192 = vmatpush1.msra.mxu0 %v2966_v19  ;;  %2388 = vmatpush3.msra.mxu1 %v3064_v41  ;;  %v3879_v19 = vld [vmem:[#allocation38_spill] sm:$0xff] }
 0x37e   :  { %1193 = vmatprep.subr.mxu0 %v2970_v20  ;;  %2389 = vmatprep.subr.mxu1 %v3858_v45 }
 0x37f   :  { %1194 = vmatpush1.msra.mxu0 %v2974_v21  ;;  %2390 = vmatpush3.msra.mxu1 %v3070_v42 }
 0x380   :  { %1195 = vmatprep.subr.mxu0 %v3859_v29  ;;  %2391 = vmatprep.subr.mxu1 %v3858_v45 }
 0x381   :  { %1196 = vmatpush1.msra.mxu0 %v3868_v47  ;;  %2392 = vmatpush3.msra.mxu1 %v3869_v48 }
 0x382   :  { %1197 = vmatprep.subr.mxu0 %v3870_v50  ;;  %2393 = vmatprep.subr.mxu1 %v3858_v45  ;;  %v3451_v50 = vld [vmem:[#allocation9 + $0x178] sm:$0xff] }
 0x383   :  { %1198 = vmatpush1.msra.mxu0 %v3871_v52  ;;  %1231 = vmatprep.mubr.f32.mxu0 %v3858_v45  ;;  %v3457_v52 = vld [vmem:[#allocation9 + $0x160] sm:$0xff] }
 0x384   :  { %2394 = vmatpush3.msra.mxu1 %v3872_v53  ;;  %2395 = vmatprep.mubr.msk.f32.mxu1 %vm2798_vm0, %v3858_v45 }
 0x385   :  { %1340 = vmatprep.subr.mxu0 %v3435_v56  ;;  %2398 = vmatprep.subr.mxu1 %v3858_v45 }
 0x424   :  { %v1060_v58 = vpop.f32.mrf.mxu0  ;;  %v1131_v59 = vpop.f32.mrf.mxu1 }
 0x425   :  { %v1135_v62 = vadd.f32 %v1060_v58, %v3877_v60  ;;  %v1149_v15 = vadd.f32 %v3190_v43, %v1131_v59  ;;  %v3536_v58 = vld [vmem:[#allocation9 + $0x60] sm:$0xff]  ;;  %v3544_v59 = vld [vmem:[#allocation9 + $0x48] sm:$0xff]  ;;  %v3552_v60 = vld [vmem:[#allocation9 + $0x30] sm:$0xff] }
 0x426   :  { %v2362_v1 = vpop.f32.mrf.mxu1  ;;  %v1062_v3 = vpop.f32.mrf.mxu0 }
 0x427   :  { %v1986_v2 = vmul.f32 -1.442695, %v1135_v62  ;;  %v1142_v7 = vadd.f32 %v1062_v3, %v3878_v5  ;;  %v3560_v62 = vld [vmem:[#allocation9 + $0x18] sm:$0xff]  ;;  %v3568_v1 = vld [vmem:[#allocation9] sm:$0xff] }
 0x428   :  { %3880 = vst [vmem:[#allocation18_spill] sm:$0xff] %v3560_v62  ;;  %3882 = vst [vmem:[#allocation25_spill] sm:$0xff] %v3568_v1 }
 0x429   :  { %2581 = vpow2.f32 %v1986_v2  ;;  %v1987_v8 = vmul.f32 -1.442695, %v1142_v7  ;;  %v3883_v2 = vld [vmem:[#allocation30_spill] sm:$0xff] }
 0x42b   :  { %2583 = vpow2.f32 %v1987_v8 }
 0x436   :  { %v2582_v9 = vpop.eup %2581 }
 0x437   :  { %v1139_v11 = vadd.f32 1.0, %v2582_v9  ;;  %v3884_v9 = vld [vmem:[#allocation31_spill] sm:$0xff] }
 0x438   :  { %v2584_v13 = vpop.eup %2583 }
 0x439   :  { %2585 = vrcp.f32 %v1139_v11  ;;  %v1146_v14 = vadd.f32 1.0, %v2584_v13 }
 0x43b   :  { %2587 = vrcp.f32 %v1146_v14 }
 0x446   :  { %v2586_v16 = vpop.eup %2585 }
 0x447   :  { %v1150_v18 = vmul.f32 %v2586_v16, %v1149_v15 }
 0x448   :  { %v2588_v21 = vpop.eup %2587 }
 0x449   :  { %v1151_v20 = vadd.f32 %v1150_v18, %v3879_v19  ;;  %v1153_v28 = vsub.f32 1.0, %v2588_v21  ;;  %v1155_v33 = vmul.f32 %v2588_v21, %v3354_v17  ;;  %v3885_v21 = vld [vmem:[#allocation41_spill] sm:$0xff] }
 0x44b   :  { %2589 = vtanh.f32 %v1151_v20 }
 0x458   :  { %v2590_v30 = vpop.eup %2589 }
 0x459   :  { %v1154_v31 = vmul.f32 %v2590_v30, %v1153_v28 }
 0x45b   :  { %v1156_v29 = vadd.f32 %v1155_v33, %v1154_v31 }
 0x45d   :  { %v3446_v47 = vsel %vm1988_vm4, %v1156_v29, %v3354_v17  ;;  %v3528_v17 = vld [vmem:[#allocation9 + $0x78] sm:$0xff] }
 0x45e   :  { %1232 = vmatmul.mubr.f32.vlgmr.msra.gmra.mxu0 %v3446_v47  ;;  %2396 = vmatmul.mubr.f32.vlgmr.msra.gmra.mxu1 %v3446_v47 }
 0x45f   :  { %1341 = vmatpush1.msra.mxu0 %v3358_v24  ;;  %2399 = vmatpush3.msra.mxu1 %v3451_v50 }
 0x460   :  { %1342 = vmatprep.subr.mxu0 %v3362_v25  ;;  %2400 = vmatprep.subr.mxu1 %v3858_v45 }
 0x461   :  { %1343 = vmatpush1.msra.mxu0 %v3366_v63  ;;  %2401 = vmatpush3.msra.mxu1 %v3457_v52 }
 0x462   :  { %1344 = vmatprep.subr.mxu0 %v3370_v26  ;;  %2402 = vmatprep.subr.mxu1 %v3858_v45 }
 0x463   :  { %1345 = vmatpush1.msra.mxu0 %v3374_v44  ;;  %2403 = vmatpush3.msra.mxu1 %v3463_v27 }
 0x464   :  { %1346 = vmatprep.subr.mxu0 %v3378_v22  ;;  %2404 = vmatprep.subr.mxu1 %v3858_v45 }
 0x465   :  { %1347 = vmatpush1.msra.mxu0 %v3468_v57  ;;  %2405 = vmatpush3.msra.mxu1 %v3471_v49 }
 0x466   :  { %1348 = vmatprep.subr.mxu0 %v3474_v0  ;;  %2406 = vmatprep.subr.mxu1 %v3858_v45 }
 0x467   :  { %1349 = vmatpush1.msra.mxu0 %v3478_v23  ;;  %2407 = vmatpush3.msra.mxu1 %v3481_v4 }
 0x468   :  { %1350 = vmatprep.subr.mxu0 %v3484_v46  ;;  %2408 = vmatprep.subr.mxu1 %v3858_v45 }
 0x469   :  { %1351 = vmatpush1.msra.mxu0 %v3488_v54  ;;  %2409 = vmatpush3.msra.mxu1 %v3024_v34  ;;  %v3508_v34 = vld [vmem:[#allocation9 + $0xb0] sm:$0xff] }
 0x46a   :  { %1352 = vmatprep.subr.mxu0 %v3492_v51  ;;  %2410 = vmatprep.subr.mxu1 %v3858_v45 }
 0x46b   :  { %1353 = vmatpush1.msra.mxu0 %v3496_v61  ;;  %2411 = vmatpush3.msra.mxu1 %v3029_v35  ;;  %v3516_v35 = vld [vmem:[#allocation9 + $0x98] sm:$0xff] }
 0x46c   :  { %1354 = vmatprep.subr.mxu0 %v3500_v32  ;;  %2412 = vmatprep.subr.mxu1 %v3858_v45 }
 0x46d   :  { %1355 = vmatpush1.msra.mxu0 %v3504_v12  ;;  %2413 = vmatpush3.msra.mxu1 %v3034_v36  ;;  %v3524_v36 = vld [vmem:[#allocation9 + $0x80] sm:$0xff] }
 0x46e   :  { %1356 = vmatprep.subr.mxu0 %v3508_v34  ;;  %2414 = vmatprep.subr.mxu1 %v3858_v45 }
 0x46f   :  { %1357 = vmatpush1.msra.mxu0 %v3512_v6  ;;  %2415 = vmatpush3.msra.mxu1 %v3040_v37  ;;  %v3532_v37 = vld [vmem:[#allocation9 + $0x68] sm:$0xff] }
 0x470   :  { %1358 = vmatprep.subr.mxu0 %v3516_v35  ;;  %2416 = vmatprep.subr.mxu1 %v3858_v45 }
 0x471   :  { %1359 = vmatpush1.msra.mxu0 %v3520_v10  ;;  %2417 = vmatpush3.msra.mxu1 %v3046_v38  ;;  %v3540_v38 = vld [vmem:[#allocation9 + $0x50] sm:$0xff] }
 0x472   :  { %1360 = vmatprep.subr.mxu0 %v3524_v36  ;;  %2418 = vmatprep.subr.mxu1 %v3858_v45 }
 0x473   :  { %1361 = vmatpush1.msra.mxu0 %v3528_v17  ;;  %2419 = vmatpush3.msra.mxu1 %v3052_v39  ;;  %v3548_v39 = vld [vmem:[#allocation9 + $0x38] sm:$0xff] }
 0x474   :  { %1362 = vmatprep.subr.mxu0 %v3532_v37  ;;  %2420 = vmatprep.subr.mxu1 %v3858_v45 }
 0x475   :  { %1363 = vmatpush1.msra.mxu0 %v3536_v58  ;;  %2421 = vmatpush3.msra.mxu1 %v3058_v40  ;;  %v3556_v40 = vld [vmem:[#allocation9 + $0x20] sm:$0xff] }
 0x476   :  { %1364 = vmatprep.subr.mxu0 %v3540_v38  ;;  %2422 = vmatprep.subr.mxu1 %v3858_v45 }
 0x477   :  { %1365 = vmatpush1.msra.mxu0 %v3544_v59  ;;  %2423 = vmatpush3.msra.mxu1 %v3064_v41  ;;  %v3564_v41 = vld [vmem:[#allocation9 + $0x8] sm:$0xff] }
 0x478   :  { %1366 = vmatprep.subr.mxu0 %v3548_v39  ;;  %2424 = vmatprep.subr.mxu1 %v3858_v45  ;;  %3881 = vst [vmem:[#allocation24_spill] sm:$0xff] %v3564_v41 }
 0x479   :  { %1367 = vmatpush1.msra.mxu0 %v3552_v60  ;;  %2425 = vmatpush3.msra.mxu1 %v3070_v42 }
 0x47a   :  { %1368 = vmatprep.subr.mxu0 %v3556_v40  ;;  %2426 = vmatprep.subr.mxu1 %v3858_v45 }
 0x47b   :  { %1369 = vmatpush1.msra.mxu0 %v3560_v62  ;;  %2427 = vmatpush3.msra.mxu1 %v3869_v48 }
 0x47c   :  { %1370 = vmatprep.subr.mxu0 %v3564_v41  ;;  %2428 = vmatprep.subr.mxu1 %v3858_v45 }
 0x47d   :  { %1371 = vmatpush1.msra.mxu0 %v3568_v1  ;;  %1404 = vmatprep.mubr.f32.mxu0 %v3858_v45 }
 0x47e   :  { %2429 = vmatpush3.msra.mxu1 %v3872_v53  ;;  %2430 = vmatprep.mubr.msk.f32.mxu1 %vm2798_vm0, %v3858_v45 }
 0x47f   :  { %1513 = vmatprep.subr.mxu0 %v3435_v56  ;;  %2433 = vmatprep.subr.mxu1 %v3858_v45 }
 0x51e   :  { %v1233_v42 = vpop.f32.mrf.mxu0  ;;  %v1304_v48 = vpop.f32.mrf.mxu1 }
 0x51f   :  { %v1308_v3 = vadd.f32 %v1233_v42, %v3883_v2  ;;  %v1322_v18 = vadd.f32 %v3190_v43, %v1304_v48  ;;  %v3615_v48 = vld [vmem:[#allocation9 + $0xe8] sm:$0xff] }
 0x520   :  { %v2397_v5 = vpop.f32.mrf.mxu1  ;;  %v1235_v8 = vpop.f32.mrf.mxu0 }
 0x521   :  { %v1989_v7 = vmul.f32 -1.442695, %v1308_v3  ;;  %v1315_v11 = vadd.f32 %v1235_v8, %v3884_v9  ;;  %v3621_v5 = vld [vmem:[#allocation9 + $0xd0] sm:$0xff]  ;;  %v3633_v8 = vld [vmem:[#allocation9 + $0xa0] sm:$0xff]  ;;  %v3639_v9 = vld [vmem:[#allocation9 + $0x88] sm:$0xff] }
 0x523   :  { %2591 = vpow2.f32 %v1989_v7  ;;  %v1990_v13 = vmul.f32 -1.442695, %v1315_v11  ;;  %v3627_v7 = vld [vmem:[#allocation9 + $0xb8] sm:$0xff]  ;;  %v3645_v11 = vld [vmem:[#allocation9 + $0x70] sm:$0xff] }
 0x525   :  { %2593 = vpow2.f32 %v1990_v13  ;;  %v3651_v13 = vld [vmem:[#allocation9 + $0x58] sm:$0xff] }
 0x530   :  { %v2592_v53 = vpop.eup %2591 }
 0x531   :  { %v1312_v14 = vadd.f32 1.0, %v2592_v53  ;;  %v3657_v53 = vld [vmem:[#allocation9 + $0x40] sm:$0xff] }
 0x532   :  { %v2594_v15 = vpop.eup %2593 }
 0x533   :  { %2595 = vrcp.f32 %v1312_v14  ;;  %v1319_v16 = vadd.f32 1.0, %v2594_v15  ;;  %v3663_v14 = vld [vmem:[#allocation9 + $0x28] sm:$0xff]  ;;  %v3670_v15 = vld [vmem:[#allocation9 + $0x10] sm:$0xff] }
 0x534   :  { %3886 = vst [vmem:[#allocation19_spill] sm:$0xff] %v3663_v14  ;;  %3887 = vst [vmem:[#allocation22_spill] sm:$0xff] %v3670_v15 }
 0x535   :  { %2597 = vrcp.f32 %v1319_v16 }
 0x540   :  { %v2596_v19 = vpop.eup %2595 }
 0x541   :  { %v1323_v20 = vmul.f32 %v2596_v19, %v1322_v18  ;;  %v3888_v19 = vld [vmem:[#allocation32_spill] sm:$0xff] }
 0x542   :  { %v2598_v30 = vpop.eup %2597 }
 0x543   :  { %v1324_v28 = vadd.f32 %v1323_v20, %v3885_v21  ;;  %v1326_v31 = vsub.f32 1.0, %v2598_v30  ;;  %v1328_v42 = vmul.f32 %v2598_v30, %v3446_v47 }
 0x545   :  { %2599 = vtanh.f32 %v1324_v28 }
 0x552   :  { %v2600_v33 = vpop.eup %2599 }
 0x553   :  { %v1327_v29 = vmul.f32 %v2600_v33, %v1326_v31  ;;  %v3889_v31 = vld [vmem:[#allocation33_spill] sm:$0xff] }
 0x555   :  { %v1329_v2 = vadd.f32 %v1328_v42, %v1327_v29 }
 0x557   :  { %v3584_v3 = vsel %vm1991_vm5, %v1329_v2, %v3446_v47  ;;  %v3609_v47 = vld [vmem:[#allocation9 + $0x100] sm:$0xff] }
 0x558   :  { %1405 = vmatmul.mubr.f32.vlgmr.msra.gmra.mxu0 %v3584_v3  ;;  %2431 = vmatmul.mubr.f32.vlgmr.msra.gmra.mxu1 %v3584_v3 }
 0x559   :  { %1514 = vmatpush1.msra.mxu0 %v3358_v24  ;;  %2434 = vmatpush3.msra.mxu1 %v3451_v50 }
 0x55a   :  { %1515 = vmatprep.subr.mxu0 %v3362_v25  ;;  %2435 = vmatprep.subr.mxu1 %v3858_v45 }
 0x55b   :  { %1516 = vmatpush1.msra.mxu0 %v3366_v63  ;;  %2436 = vmatpush3.msra.mxu1 %v3457_v52 }
 0x55c   :  { %1517 = vmatprep.subr.mxu0 %v3370_v26  ;;  %2437 = vmatprep.subr.mxu1 %v3858_v45 }
 0x55d   :  { %1518 = vmatpush1.msra.mxu0 %v3374_v44  ;;  %2438 = vmatpush3.msra.mxu1 %v3463_v27 }
 0x55e   :  { %1519 = vmatprep.subr.mxu0 %v3378_v22  ;;  %2439 = vmatprep.subr.mxu1 %v3858_v45 }
 0x55f   :  { %1520 = vmatpush1.msra.mxu0 %v3468_v57  ;;  %2440 = vmatpush3.msra.mxu1 %v3471_v49 }
 0x560   :  { %1521 = vmatprep.subr.mxu0 %v3474_v0  ;;  %2441 = vmatprep.subr.mxu1 %v3858_v45 }
 0x561   :  { %1522 = vmatpush1.msra.mxu0 %v3478_v23  ;;  %2442 = vmatpush3.msra.mxu1 %v3481_v4 }
 0x562   :  { %1523 = vmatprep.subr.mxu0 %v3484_v46  ;;  %2443 = vmatprep.subr.mxu1 %v3858_v45 }
 0x563   :  { %1524 = vmatpush1.msra.mxu0 %v3488_v54  ;;  %2444 = vmatpush3.msra.mxu1 %v3609_v47 }
 0x564   :  { %1525 = vmatprep.subr.mxu0 %v3492_v51  ;;  %2445 = vmatprep.subr.mxu1 %v3858_v45 }
 0x565   :  { %1526 = vmatpush1.msra.mxu0 %v3496_v61  ;;  %2446 = vmatpush3.msra.mxu1 %v3615_v48 }
 0x566   :  { %1527 = vmatprep.subr.mxu0 %v3500_v32  ;;  %2447 = vmatprep.subr.mxu1 %v3858_v45 }
 0x567   :  { %1528 = vmatpush1.msra.mxu0 %v3504_v12  ;;  %2448 = vmatpush3.msra.mxu1 %v3621_v5 }
 0x568   :  { %1529 = vmatprep.subr.mxu0 %v3508_v34  ;;  %2449 = vmatprep.subr.mxu1 %v3858_v45 }
 0x569   :  { %1530 = vmatpush1.msra.mxu0 %v3512_v6  ;;  %2450 = vmatpush3.msra.mxu1 %v3627_v7 }
 0x56a   :  { %1531 = vmatprep.subr.mxu0 %v3516_v35  ;;  %2451 = vmatprep.subr.mxu1 %v3858_v45 }
 0x56b   :  { %1532 = vmatpush1.msra.mxu0 %v3520_v10  ;;  %2452 = vmatpush3.msra.mxu1 %v3633_v8 }
 0x56c   :  { %1533 = vmatprep.subr.mxu0 %v3524_v36  ;;  %2453 = vmatprep.subr.mxu1 %v3858_v45 }
 0x56d   :  { %1534 = vmatpush1.msra.mxu0 %v3528_v17  ;;  %2454 = vmatpush3.msra.mxu1 %v3639_v9 }
 0x56e   :  { %1535 = vmatprep.subr.mxu0 %v3532_v37  ;;  %2455 = vmatprep.subr.mxu1 %v3858_v45 }
 0x56f   :  { %1536 = vmatpush1.msra.mxu0 %v3536_v58  ;;  %2456 = vmatpush3.msra.mxu1 %v3645_v11 }
 0x570   :  { %1537 = vmatprep.subr.mxu0 %v3540_v38  ;;  %2457 = vmatprep.subr.mxu1 %v3858_v45 }
 0x571   :  { %1538 = vmatpush1.msra.mxu0 %v3544_v59  ;;  %2458 = vmatpush3.msra.mxu1 %v3651_v13 }
 0x572   :  { %1539 = vmatprep.subr.mxu0 %v3548_v39  ;;  %2459 = vmatprep.subr.mxu1 %v3858_v45 }
 0x573   :  { %1540 = vmatpush1.msra.mxu0 %v3552_v60  ;;  %2460 = vmatpush3.msra.mxu1 %v3657_v53 }
 0x574   :  { %1541 = vmatprep.subr.mxu0 %v3556_v40  ;;  %2461 = vmatprep.subr.mxu1 %v3858_v45 }
 0x575   :  { %1542 = vmatpush1.msra.mxu0 %v3560_v62  ;;  %2462 = vmatpush3.msra.mxu1 %v3663_v14  ;;  %v3890_v62 = vld [vmem:[#allocation40_spill] sm:$0xff] }
 0x576   :  { %1543 = vmatprep.subr.mxu0 %v3564_v41  ;;  %2463 = vmatprep.subr.mxu1 %v3858_v45 }
 0x577   :  { %1544 = vmatpush1.msra.mxu0 %v3568_v1  ;;  %1577 = vmatprep.mubr.f32.mxu0 %v3858_v45 }
 0x578   :  { %2464 = vmatpush3.msra.mxu1 %v3670_v15  ;;  %2465 = vmatprep.mubr.msk.f32.mxu1 %vm2798_vm0, %v3858_v45 }
 0x579   :  { %1686 = vmatprep.subr.mxu0 %v3435_v56  ;;  %2468 = vmatprep.subr.mxu1 %v3858_v45 }
 0x618   :  { %v1406_v16 = vpop.f32.mrf.mxu0  ;;  %v1477_v18 = vpop.f32.mrf.mxu1 }
 0x619   :  { %v1481_v20 = vadd.f32 %v1406_v16, %v3888_v19  ;;  %v1495_v56 = vadd.f32 %v3190_v43, %v1477_v18  ;;  %v3891_v43 = vld [vmem:[#allocation18_spill] sm:$0xff] }
 0x61a   :  { %v2432_v21 = vpop.f32.mrf.mxu1  ;;  %v1408_v30 = vpop.f32.mrf.mxu0 }
 0x61b   :  { %v1992_v28 = vmul.f32 -1.442695, %v1481_v20  ;;  %v1488_v33 = vadd.f32 %v1408_v30, %v3889_v31 }
 0x61d   :  { %2601 = vpow2.f32 %v1992_v28  ;;  %v1993_v29 = vmul.f32 -1.442695, %v1488_v33 }
 0x61f   :  { %2603 = vpow2.f32 %v1993_v29  ;;  %v3899_v29 = vld [vmem:[#allocation36_spill] sm:$0xff] }
 0x62a   :  { %v2602_v42 = vpop.eup %2601 }
 0x62b   :  { %v1485_v2 = vadd.f32 1.0, %v2602_v42 }
 0x62c   :  { %v2604_v15 = vpop.eup %2603 }
 0x62d   :  { %2605 = vrcp.f32 %v1485_v2  ;;  %v1492_v1 = vadd.f32 1.0, %v2604_v15 }
 0x62f   :  { %2607 = vrcp.f32 %v1492_v1  ;;  %v1869_v1 = vld [vmem:[#allocation10 + $0x58] sm:$0xff] }
 0x63a   :  { %v2606_v41 = vpop.eup %2605 }
 0x63b   :  { %v1496_v14 = vmul.f32 %v2606_v41, %v1495_v56  ;;  %v1870_v41 = vld [vmem:[#allocation10 + $0x60] sm:$0xff] }
 0x63c   :  { %v2608_v19 = vpop.eup %2607 }
 0x63d   :  { %v1497_v16 = vadd.f32 %v1496_v14, %v3890_v62  ;;  %v1499_v20 = vsub.f32 1.0, %v2608_v19  ;;  %v1501_v30 = vmul.f32 %v2608_v19, %v3584_v3  ;;  %v1871_v62 = vld [vmem:[#allocation10 + $0x68] sm:$0xff]  ;;  %v1858_v14 = vld [vmem:[#allocation10] sm:$0xff] }
 0x63e   :  { %v3900_v19 = vld [vmem:[#allocation37_spill] sm:$0xff] }
 0x63f   :  { %2609 = vtanh.f32 %v1497_v16 }
 0x64c   :  { %v2610_v21 = vpop.eup %2609 }
 0x64d   :  { %v1500_v28 = vmul.f32 %v2610_v21, %v1499_v20 }
 0x64f   :  { %v1502_v31 = vadd.f32 %v1501_v30, %v1500_v28 }
 0x651   :  { %v3684_v33 = vsel %vm1994_vm6, %v1502_v31, %v3584_v3  ;;  %v1868_v3 = vld [vmem:[#allocation10 + $0x50] sm:$0xff] }
 0x652   :  { %1578 = vmatmul.mubr.f32.vlgmr.msra.gmra.mxu0 %v3684_v33  ;;  %2466 = vmatmul.mubr.f32.vlgmr.msra.gmra.mxu1 %v3684_v33 }
 0x653   :  { %1687 = vmatpush1.msra.mxu0 %v3358_v24  ;;  %2469 = vmatpush3.msra.mxu1 %v3451_v50  ;;  %v3892_v24 = vld [vmem:[#allocation19_spill] sm:$0xff]  ;;  %v3896_v50 = vld [vmem:[#allocation34_spill] sm:$0xff] }
 0x654   :  { %1688 = vmatprep.subr.mxu0 %v3362_v25  ;;  %2470 = vmatprep.subr.mxu1 %v3858_v45  ;;  %v3893_v25 = vld [vmem:[#allocation24_spill] sm:$0xff] }
 0x655   :  { %1689 = vmatpush1.msra.mxu0 %v3366_v63  ;;  %2471 = vmatpush3.msra.mxu1 %v3457_v52  ;;  %v3894_v63 = vld [vmem:[#allocation25_spill] sm:$0xff] }
 0x656   :  { %1690 = vmatprep.subr.mxu0 %v3370_v26  ;;  %2472 = vmatprep.subr.mxu1 %v3858_v45  ;;  %v3895_v26 = vld [vmem:[#allocation22_spill] sm:$0xff] }
 0x657   :  { %1691 = vmatpush1.msra.mxu0 %v3374_v44  ;;  %2473 = vmatpush3.msra.mxu1 %v3463_v27 }
 0x658   :  { %1692 = vmatprep.subr.mxu0 %v3378_v22  ;;  %2474 = vmatprep.subr.mxu1 %v3858_v45 }
 0x659   :  { %1693 = vmatpush1.msra.mxu0 %v3468_v57  ;;  %2475 = vmatpush3.msra.mxu1 %v3471_v49 }
 0x65a   :  { %1694 = vmatprep.subr.mxu0 %v3474_v0  ;;  %2476 = vmatprep.subr.mxu1 %v3858_v45  ;;  %v3897_v0 = vld [vmem:[#allocation35_spill] sm:$0xff] }
 0x65b   :  { %1695 = vmatpush1.msra.mxu0 %v3478_v23  ;;  %2477 = vmatpush3.msra.mxu1 %v3481_v4 }
 0x65c   :  { %1696 = vmatprep.subr.mxu0 %v3484_v46  ;;  %2478 = vmatprep.subr.mxu1 %v3858_v45 }
 0x65d   :  { %1697 = vmatpush1.msra.mxu0 %v3488_v54  ;;  %2479 = vmatpush3.msra.mxu1 %v3609_v47  ;;  %v1867_v47 = vld [vmem:[#allocation10 + $0x48] sm:$0xff] }
 0x65e   :  { %1698 = vmatprep.subr.mxu0 %v3492_v51  ;;  %2480 = vmatprep.subr.mxu1 %v3858_v45 }
 0x65f   :  { %1699 = vmatpush1.msra.mxu0 %v3496_v61  ;;  %2481 = vmatpush3.msra.mxu1 %v3615_v48  ;;  %v1866_v48 = vld [vmem:[#allocation10 + $0x40] sm:$0xff] }
 0x660   :  { %1700 = vmatprep.subr.mxu0 %v3500_v32  ;;  %2482 = vmatprep.subr.mxu1 %v3858_v45  ;;  %v3759_v32 = vld [vmem:[%s3806_s6] ss:$0 sm:$0xff] }
 0x661   :  { %1701 = vmatpush1.msra.mxu0 %v3504_v12  ;;  %2483 = vmatpush3.msra.mxu1 %v3621_v5  ;;  %v1865_v5 = vld [vmem:[#allocation10 + $0x38] sm:$0xff] }
 0x662   :  { %1702 = vmatprep.subr.mxu0 %v3508_v34  ;;  %2484 = vmatprep.subr.mxu1 %v3858_v45 }
 0x663   :  { %1703 = vmatpush1.msra.mxu0 %v3512_v6  ;;  %2485 = vmatpush3.msra.mxu1 %v3627_v7  ;;  %v1864_v7 = vld [vmem:[#allocation10 + $0x30] sm:$0xff] }
 0x664   :  { %1704 = vmatprep.subr.mxu0 %v3516_v35  ;;  %2486 = vmatprep.subr.mxu1 %v3858_v45  ;;  %v3898_v35 = vld [vmem:[#allocation43_spill] sm:$0xff] }
 0x665   :  { %1705 = vmatpush1.msra.mxu0 %v3520_v10  ;;  %2487 = vmatpush3.msra.mxu1 %v3633_v8  ;;  %v1863_v8 = vld [vmem:[#allocation10 + $0x28] sm:$0xff] }
 0x666   :  { %1706 = vmatprep.subr.mxu0 %v3524_v36  ;;  %2488 = vmatprep.subr.mxu1 %v3858_v45 }
 0x667   :  { %1707 = vmatpush1.msra.mxu0 %v3528_v17  ;;  %2489 = vmatpush3.msra.mxu1 %v3639_v9  ;;  %v1862_v9 = vld [vmem:[#allocation10 + $0x20] sm:$0xff] }
 0x668   :  { %1708 = vmatprep.subr.mxu0 %v3532_v37  ;;  %2490 = vmatprep.subr.mxu1 %v3858_v45 }
 0x669   :  { %1709 = vmatpush1.msra.mxu0 %v3536_v58  ;;  %2491 = vmatpush3.msra.mxu1 %v3645_v11  ;;  %v1861_v11 = vld [vmem:[#allocation10 + $0x18] sm:$0xff] }
 0x66a   :  { %1710 = vmatprep.subr.mxu0 %v3540_v38  ;;  %2492 = vmatprep.subr.mxu1 %v3858_v45 }
 0x66b   :  { %1711 = vmatpush1.msra.mxu0 %v3544_v59  ;;  %2493 = vmatpush3.msra.mxu1 %v3651_v13  ;;  %v1860_v13 = vld [vmem:[#allocation10 + $0x10] sm:$0xff] }
 0x66c   :  { %1712 = vmatprep.subr.mxu0 %v3548_v39  ;;  %2494 = vmatprep.subr.mxu1 %v3858_v45 }
 0x66d   :  { %1713 = vmatpush1.msra.mxu0 %v3552_v60  ;;  %2495 = vmatpush3.msra.mxu1 %v3657_v53  ;;  %v1873_v60 = vld [vmem:[#allocation10 + $0x78] sm:$0xff]  ;;  %v1859_v53 = vld [vmem:[#allocation10 + $0x8] sm:$0xff] }
 0x66e   :  { %1714 = vmatprep.subr.mxu0 %v3556_v40  ;;  %2496 = vmatprep.subr.mxu1 %v3858_v45  ;;  %v1872_v40 = vld [vmem:[#allocation10 + $0x70] sm:$0xff] }
 0x66f   :  { %1715 = vmatpush1.msra.mxu0 %v3891_v43  ;;  %2497 = vmatpush3.msra.mxu1 %v3892_v24 }
 0x670   :  { %1716 = vmatprep.subr.mxu0 %v3893_v25  ;;  %2498 = vmatprep.subr.mxu1 %v3858_v45  ;;  %v3901_v25 = vld [vmem:[#allocation42_spill] sm:$0xff] }
 0x671   :  { %1717 = vmatpush1.msra.mxu0 %v3894_v63  ;;  %1750 = vmatprep.mubr.f32.mxu0 %v3858_v45 }
 0x672   :  { %2499 = vmatpush3.msra.mxu1 %v3895_v26  ;;  %2500 = vmatprep.mubr.msk.f32.mxu1 %vm2798_vm0, %v3858_v45 }
 0x673   :  { %2503 = vmatprep.subr.mxu0 %v3858_v45 }
 0x712   :  { %v1579_v44 = vpop.f32.mrf.mxu0  ;;  %v1650_v22 = vpop.f32.mrf.mxu1 }
 0x713   :  { %v1654_v52 = vadd.f32 %v1579_v44, %v3896_v50  ;;  %v1668_v12 = vadd.f32 %v3759_v32, %v1650_v22 }
 0x714   :  { %v2467_v27 = vpop.f32.mrf.mxu1  ;;  %v1581_v49 = vpop.f32.mrf.mxu0 }
 0x715   :  { %v1995_v57 = vmul.f32 -1.442695, %v1654_v52  ;;  %v1661_v23 = vadd.f32 %v1581_v49, %v3897_v0  ;;  %v2001_v49 = vld [vmem:[%s3808_s8] ss:$0 sm:$0xff] }
 0x717   :  { %2611 = vpow2.f32 %v1995_v57  ;;  %v1996_v4 = vmul.f32 -1.442695, %v1661_v23 }
 0x719   :  { %2613 = vpow2.f32 %v1996_v4 }
 0x724   :  { %v2612_v46 = vpop.eup %2611 }
 0x725   :  { %v1658_v54 = vadd.f32 1.0, %v2612_v46 }
 0x726   :  { %v2614_v51 = vpop.eup %2613 }
 0x727   :  { %2615 = vrcp.f32 %v1658_v54  ;;  %v1665_v61 = vadd.f32 1.0, %v2614_v51 }
 0x729   :  { %2617 = vrcp.f32 %v1665_v61 }
 0x734   :  { %v2616_v34 = vpop.eup %2615 }
 0x735   :  { %v1669_v6 = vmul.f32 %v2616_v34, %v1668_v12 }
 0x736   :  { %v2618_v36 = vpop.eup %2617 }
 0x737   :  { %v1670_v10 = vadd.f32 %v1669_v6, %v3898_v35  ;;  %v1672_v17 = vsub.f32 1.0, %v2618_v36  ;;  %v1674_v38 = vmul.f32 %v2618_v36, %v3684_v33 }
 0x739   :  { %2619 = vtanh.f32 %v1670_v10 }
 0x746   :  { %v2620_v37 = vpop.eup %2619 }
 0x747   :  { %v1673_v58 = vmul.f32 %v2620_v37, %v1672_v17 }
 0x749   :  { %v1675_v59 = vadd.f32 %v1674_v38, %v1673_v58 }
 0x74b   :  { %v3766_v39 = vsel %vm1997_vm7, %v1675_v59, %v3684_v33 }
 0x74c   :  { %1751 = vmatmul.mubr.f32.vlgmr.msra.gmra.mxu0 %v3766_v39  ;;  %2501 = vmatmul.mubr.f32.vlgmr.msra.gmra.mxu1 %v3766_v39 }
 0x74d   :  { %2535 = vmatprep.mubr.msk.f32.mxu0 %vm2798_vm0, %v3858_v45  ;;  %2504 = vmatpush3.msra.mxu0 %v1873_v60 }
 0x74e   :  { %2505 = vmatprep.subr.mxu0 %v3858_v45 }
 0x74f   :  { %2506 = vmatpush3.msra.mxu0 %v1872_v40 }
 0x750   :  { %2507 = vmatprep.subr.mxu0 %v3858_v45 }
 0x751   :  { %2508 = vmatpush3.msra.mxu0 %v1871_v62 }
 0x752   :  { %2509 = vmatprep.subr.mxu0 %v3858_v45 }
 0x753   :  { %2510 = vmatpush3.msra.mxu0 %v1870_v41 }
 0x754   :  { %2511 = vmatprep.subr.mxu0 %v3858_v45 }
 0x755   :  { %2512 = vmatpush3.msra.mxu0 %v1869_v1 }
 0x756   :  { %2513 = vmatprep.subr.mxu0 %v3858_v45 }
 0x757   :  { %2514 = vmatpush3.msra.mxu0 %v1868_v3 }
 0x758   :  { %2515 = vmatprep.subr.mxu0 %v3858_v45 }
 0x759   :  { %2516 = vmatpush3.msra.mxu0 %v1867_v47 }
 0x75a   :  { %2517 = vmatprep.subr.mxu0 %v3858_v45 }
 0x75b   :  { %2518 = vmatpush3.msra.mxu0 %v1866_v48 }
 0x75c   :  { %2519 = vmatprep.subr.mxu0 %v3858_v45 }
 0x75d   :  { %2520 = vmatpush3.msra.mxu0 %v1865_v5 }
 0x75e   :  { %2521 = vmatprep.subr.mxu0 %v3858_v45 }
 0x75f   :  { %2522 = vmatpush3.msra.mxu0 %v1864_v7 }
 0x760   :  { %2523 = vmatprep.subr.mxu0 %v3858_v45 }
 0x761   :  { %2524 = vmatpush3.msra.mxu0 %v1863_v8 }
 0x762   :  { %2525 = vmatprep.subr.mxu0 %v3858_v45 }
 0x763   :  { %2526 = vmatpush3.msra.mxu0 %v1862_v9 }
 0x764   :  { %2527 = vmatprep.subr.mxu0 %v3858_v45 }
 0x765   :  { %2528 = vmatpush3.msra.mxu0 %v1861_v11 }
 0x766   :  { %2529 = vmatprep.subr.mxu0 %v3858_v45 }
 0x767   :  { %2530 = vmatpush3.msra.mxu0 %v1860_v13 }
 0x768   :  { %2531 = vmatprep.subr.mxu0 %v3858_v45 }
 0x769   :  { %2532 = vmatpush3.msra.mxu0 %v1859_v53 }
 0x76a   :  { %2533 = vmatprep.subr.mxu0 %v3858_v45 }
 0x76b   :  { %2534 = vmatpush3.msra.mxu0 %v1858_v14 }
 0x80c   :  { %v1752_v15 = vpop.f32.mrf.mxu0  ;;  %v1823_v18 = vpop.f32.mrf.mxu1 }
 0x80d   :  { %v1827_v42 = vadd.f32 %v1752_v15, %v3899_v29  ;;  %v1841_v45 = vadd.f32 %v3759_v32, %v1823_v18 }
 0x80e   :  { %v2502_v2 = vpop.f32.mrf.mxu1  ;;  %v1754_v16 = vpop.f32.mrf.mxu0 }
 0x80f   :  { %v1998_v56 = vmul.f32 -1.442695, %v1827_v42  ;;  %v1834_v20 = vadd.f32 %v1754_v16, %v3900_v19 }
 0x811   :  { %2621 = vpow2.f32 %v1998_v56  ;;  %v1999_v21 = vmul.f32 -1.442695, %v1834_v20 }
 0x813   :  { %2623 = vpow2.f32 %v1999_v21 }
 0x81e   :  { %v2622_v28 = vpop.eup %2621 }
 0x81f   :  { %v1831_v30 = vadd.f32 1.0, %v2622_v28 }
 0x820   :  { %v2624_v31 = vpop.eup %2623 }
 0x821   :  { %2625 = vrcp.f32 %v1831_v30  ;;  %v1838_v33 = vadd.f32 1.0, %v2624_v31 }
 0x823   :  { %2627 = vrcp.f32 %v1838_v33 }
 0x82e   :  { %v2626_v43 = vpop.eup %2625 }
 0x82f   :  { %v1842_v24 = vmul.f32 %v2626_v43, %v1841_v45 }
 0x830   :  { %v2628_v26 = vpop.eup %2627 }
 0x831   :  { %v1843_v63 = vadd.f32 %v1842_v24, %v3901_v25  ;;  %v1845_v44 = vsub.f32 1.0, %v2628_v26  ;;  %v1847_v52 = vmul.f32 %v2628_v26, %v3766_v39 }
 0x833   :  { %2629 = vtanh.f32 %v1843_v63 }
 0x840   :  { %v2630_v22 = vpop.eup %2629 }
 0x841   :  { %v1846_v50 = vmul.f32 %v2630_v22, %v1845_v44 }
 0x843   :  { %v1848_v27 = vadd.f32 %v1847_v52, %v1846_v50 }
 0x845   :  { %v1852_v57 = vsel %vm2000_vm8, %v1848_v27, %v3766_v39 }
 0x846   :  { %2536 = vmatmul.mubr.f32.vlgmr.msra.gmra.mxu0 %v1852_v57 }
 0x906   :  { %v1947_v0 = vpop.f32.mrf.mxu0 }
 0x907   :  { %v1948_v23 = vadd.f32 %v2001_v49, %v1947_v0 }
 0x908   :  { %v2537_v4 = vpop.f32.mrf.mxu0 }
 0x909   :  { %1951 = vst [vmem:[#allocation12] sm:$0xff] %v1948_v23 }
 0x90a   :  { %2771 = shalt.err (!%p2768_p10)
}
 0x90b   :  { %1961 = dma.vmem_to_hbm [thread:$0]  %s1959_s17, 128, %s3809_s9, [#allocation6]  }
 0x90c   :  { %2786 = dma.done.wait [#allocation6], 128  }
 0x90d   :  { %2787 = vsyncadd [#allocation6], 4294967168 }
 0x90e   :  { %1965 = vsyncpa [#allocation5], 1 }
 0x90f   :  { %1966 = vsyncpa [#allocation8], 1 }
 0x910   :  { %1967 = vsyncpa [#allocation11], 1 }
 0x911   :  { %1968 = vsyncpa [#allocation6], 1 }

</bundles_post_ra>
